<compile_context>
chip_gen: v7x
topology: tpu7x:2x2x1
jax: 0.10.0
libtpu: 0.0.40
codegen_flags: <defaults>
</compile_context>

<pallas_src>
import functools

import jax
import jax.numpy as jnp
from jax import lax
from jax.experimental import pallas as pl
from jax.experimental.pallas import tpu as pltpu


def _round_up(x, m):
    return ((x + m - 1) // m) * m


def _gnn_kernel(A_in_ref, A_out_ref, h_ref,
                w_in_t_ref, w_out_t_ref, w_ih_t_ref, w_hh_t_ref,
                b_in_ref, b_out_ref, b_iah_ref, b_oah_ref, b_ih_ref, b_hh_ref,
                out_ref, *, step: int, unroll: bool):
    """One batch group; every operand is 2-D, flattened over (batch, node)."""
    Hp = h_ref.shape[-1]
    mxu_dtype = w_in_t_ref.dtype

    # Hoist only the small bias rows; the large weight matrices are read at
    # their dot sites so they never sit in vregs across the step loop.
    b_in = b_in_ref[...]
    b_out = b_out_ref[...]
    b_iah = b_iah_ref[...]
    b_oah = b_oah_ref[...]
    b_ih = b_ih_ref[...]
    b_hh = b_hh_ref[...]

    h0 = h_ref[...].astype(jnp.float32)

    def body(_, h):
        h_x = h.astype(mxu_dtype)

        # linear_edge_in / linear_edge_out on the flattened (Mb, Hp) slab.
        he_in = jnp.dot(h_x, w_in_t_ref[...],
                        preferred_element_type=jnp.float32) + b_in
        he_out = jnp.dot(h_x, w_out_t_ref[...],
                         preferred_element_type=jnp.float32) + b_out

        # Block-diagonal adjacency => message passing is one dense MXU matmul
        # per direction (fills the systolic array instead of Np-row slivers).
        input_in = jnp.dot(A_in_ref[...], he_in.astype(mxu_dtype),
                           preferred_element_type=jnp.float32) + b_iah
        input_out = jnp.dot(A_out_ref[...], he_out.astype(mxu_dtype),
                            preferred_element_type=jnp.float32) + b_oah

        # gi: single fused K=2*Hp matmul (concat boundary is 128-lane aligned).
        inputs = jnp.concatenate([input_in, input_out],
                                 axis=-1).astype(mxu_dtype)
        gi = jnp.dot(inputs, w_ih_t_ref[...],
                     preferred_element_type=jnp.float32) + b_ih
        gh = jnp.dot(h_x, w_hh_t_ref[...],
                     preferred_element_type=jnp.float32) + b_hh

        # Hp is a multiple of 128 => lane-aligned gate slices (free).
        # Gate / elementwise math stays in f32 (no bf16 VPU/EUP on v5e).
        i_r, i_i, i_n = gi[:, :Hp], gi[:, Hp:2 * Hp], gi[:, 2 * Hp:]
        h_r, h_i, h_n = gh[:, :Hp], gh[:, Hp:2 * Hp], gh[:, 2 * Hp:]
        resetgate = jax.nn.sigmoid(i_r + h_r)
        inputgate = jax.nn.sigmoid(i_i + h_i)
        newgate = jnp.tanh(i_n + resetgate * h_n)
        return newgate + inputgate * (h - newgate)

    h_final = lax.fori_loop(0, step, body, h0, unroll=unroll)
    out_ref[...] = h_final.astype(out_ref.dtype)


def gnn_forward(A, hidden, params, *, step=1, block_b=None,
                matmul_dtype=jnp.bfloat16):
    """Pallas forward of GNN.forward(A, hidden).

    A:      (B, N, 2N)  [incoming | outgoing] adjacency
    hidden: (B, N, H)
    matmul_dtype: dtype of MXU operands (bf16 default; f32 for exact parity).
    """
    B, N, twoN = A.shape
    assert twoN == 2 * N
    H = hidden.shape[-1]

    Np = _round_up(N, 8)        # sublane-aligned node count
    Hp = _round_up(H, 128)      # lane-dense feature dim

    try:
        kind = jax.devices()[0].device_kind.lower()
    except Exception:  # pragma: no cover - defensive
        kind = ""
    is_v7 = "v7" in kind        # 2 TensorCores per chip, only 64 MiB VMEM

    op_bytes = jnp.dtype(matmul_dtype).itemsize
    h_bytes = jnp.dtype(hidden.dtype).itemsize

    def vmem_estimate(bb):
        mb = bb * Np
        a = 2 * 2 * mb * mb * op_bytes                       # A_in+A_out, dbl-buffered
        hio = 2 * 2 * mb * Hp * h_bytes                      # h in + out blocks
        w = 2 * (2 * Hp * Hp + 2 * Hp * 3 * Hp + Hp * 3 * Hp) * op_bytes
        live = 10 * mb * Hp * 4                              # gi/gh/he f32 temporaries
        return a + hio + w + live

    if block_b is None:
        # Fill >=256 MXU rows per matmul (v6e/v7x MXUs are 256 wide; harmless
        # on v5e), but on v7x keep >=2 grid steps so both TensorCores get work.
        row_target = 256
        bt = max(1, row_target // Np) if Np < row_target else 1
        bt = min(bt, B)
        if is_v7 and B >= 2:
            bt = min(bt, pl.cdiv(B, 2))
        block_b = max(1, bt)

    vmem_budget = (48 if is_v7 else 96) * 1024 * 1024
    while block_b > 1 and vmem_estimate(block_b) > vmem_budget:
        block_b = max(1, block_b // 2)
    est = vmem_estimate(block_b)
    vmem_limit = int(min(vmem_budget, 2 * est)) if est > 16 * 1024 * 1024 else None

    Bp = _round_up(B, block_b)
    G = Bp // block_b
    Mb = block_b * Np

    f32 = jnp.float32

    # Split + pad adjacency, then pack block_b batches into one block-diagonal
    # (Mb, Mb) matrix per grid step so message passing is a dense MXU matmul.
    # TODO(synk): producing A already split/padded upstream (or fusing these
    # pads into the pallas_call inputs) would avoid an extra HBM round-trip.
    A_in_p = jnp.pad(A[:, :, :N].astype(f32),
                     ((0, Bp - B), (0, Np - N), (0, Np - N)))
    A_out_p = jnp.pad(A[:, :, N:].astype(f32),
                      ((0, Bp - B), (0, Np - N), (0, Np - N)))

    def block_diag(a):                      # (Bp, Np, Np) -> (G*Mb, Mb)
        a_g = a.reshape(G, block_b, Np, Np)
        eye = jnp.eye(block_b, dtype=a.dtype)
        bd = jnp.einsum('ij,girc->girjc', eye, a_g)
        return bd.reshape(G * Mb, Mb)

    A_in_bd = block_diag(A_in_p).astype(matmul_dtype)
    A_out_bd = block_diag(A_out_p).astype(matmul_dtype)

    h_p = jnp.pad(hidden, ((0, Bp - B), (0, Np - N), (0, Hp - H)))
    h_p = h_p.reshape(Bp * Np, Hp)

    def pad_vec(b):                         # (H,) -> (1, Hp), kept f32
        return jnp.pad(b.astype(f32), (0, Hp - b.shape[0])).reshape(1, Hp)

    def pad_sq_t(w):                        # (H, H) -> (Hp, Hp), pre-transposed
        return jnp.pad(w.astype(f32), ((0, Hp - H), (0, Hp - H))).T

    def pad_gate_w_t(w3):                   # (3, H, in) -> (Hp, 3*Hp)
        in_dim = w3.shape[-1]
        w3p = jnp.pad(w3.astype(f32),
                      ((0, 0), (0, Hp - H), (0, Hp - in_dim)))
        return jnp.transpose(w3p, (2, 0, 1)).reshape(Hp, 3 * Hp)

    def pad_gate_b(b):                      # (3H,) -> (1, 3*Hp), kept f32
        return jnp.pad(b.astype(f32).reshape(3, H),
                       ((0, 0), (0, Hp - H))).reshape(1, 3 * Hp)

    # Gate weights: per-gate re-pack so gi/gh slices land on Hp boundaries;
    # w_ih's input_in / input_out halves are stacked row-wise into one
    # (2*Hp, 3*Hp) matrix => a single K=2*Hp gi matmul in the kernel.
    w_ih3 = params["w_ih"].reshape(3, H, 2 * H)
    w_ih_t = jnp.concatenate([pad_gate_w_t(w_ih3[:, :, :H]),
                              pad_gate_w_t(w_ih3[:, :, H:])],
                             axis=0).astype(matmul_dtype)           # (2Hp, 3Hp)
    w_hh_t = pad_gate_w_t(params["w_hh"].reshape(3, H, H)).astype(matmul_dtype)
    w_in_t = pad_sq_t(params["w_in"]).astype(matmul_dtype)
    w_out_t = pad_sq_t(params["w_out"]).astype(matmul_dtype)
    b_in = pad_vec(params["b_in"])
    b_out = pad_vec(params["b_out"])
    b_iah = pad_vec(params["b_iah"])
    b_oah = pad_vec(params["b_oah"])
    b_ih = pad_gate_b(params["b_ih"])
    b_hh = pad_gate_b(params["b_hh"])

    operands = (A_in_bd, A_out_bd, h_p, w_in_t, w_out_t, w_ih_t, w_hh_t,
                b_in, b_out, b_iah, b_oah, b_ih, b_hh)

    flops = step * G * (4 * Mb * Hp * Hp          # he_in + he_out
                        + 4 * Mb * Mb * Hp        # A_in / A_out message passing
                        + 12 * Mb * Hp * Hp       # gi (K=2Hp, N=3Hp)
                        + 6 * Mb * Hp * Hp)       # gh
    transcendentals = step * G * Mb * 3 * Hp
    bytes_accessed = int(sum(x.size * x.dtype.itemsize for x in operands)
                         + Bp * Np * Hp * h_bytes)

    full = lambda shape: pl.BlockSpec(shape, lambda g: (0,) * len(shape))

    out = pl.pallas_call(
        functools.partial(_gnn_kernel, step=step, unroll=step <= 4),
        out_shape=jax.ShapeDtypeStruct((G * Mb, Hp), hidden.dtype),
        grid=(G,),
        in_specs=[
            pl.BlockSpec((Mb, Mb), lambda g: (g, 0)),      # A_in  (block-diag)
            pl.BlockSpec((Mb, Mb), lambda g: (g, 0)),      # A_out (block-diag)
            pl.BlockSpec((Mb, Hp), lambda g: (g, 0)),      # hidden slab
            full((Hp, Hp)), full((Hp, Hp)),                # w_in_t, w_out_t
            full((2 * Hp, 3 * Hp)), full((Hp, 3 * Hp)),    # w_ih_t, w_hh_t
            full((1, Hp)), full((1, Hp)),                  # b_in, b_out
            full((1, Hp)), full((1, Hp)),                  # b_iah, b_oah
            full((1, 3 * Hp)), full((1, 3 * Hp)),          # b_ih, b_hh
        ],
        out_specs=pl.BlockSpec((Mb, Hp), lambda g: (g, 0)),
        compiler_params=pltpu.CompilerParams(
            dimension_semantics=("parallel",),
            vmem_limit_bytes=vmem_limit),
        cost_estimate=pl.CostEstimate(flops=flops,
                                      transcendentals=transcendentals,
                                      bytes_accessed=bytes_accessed),
    )(*operands)

    # NOTE: padded node rows / padded batches are NOT zero after step 1 (the
    # broadcast biases land on them too).  They are isolated (padded A rows /
    # columns are zero, so they never feed real rows) and sliced off here —
    # do not reuse the padded buffer as a next-step input without re-zeroing.
    return out.reshape(Bp, Np, Hp)[:B, :N, :H]


def gnn_reference(A, hidden, params, *, step=1, matmul_dtype=jnp.float32):
    """Pure-JAX reference mirroring the PyTorch GNNCell.

    matmul_dtype lets the reference emulate the kernel's bf16-operand /
    f32-accumulate MXU matmuls for an apples-to-apples comparison.
    """
    N = A.shape[1]
    md = matmul_dtype

    def mm(a, b):
        return jnp.matmul(a.astype(md), b.astype(md),
                          preferred_element_type=jnp.float32)

    h = hidden.astype(jnp.float32)
    for _ in range(step):
        he_in = mm(h, params["w_in"].T) + params["b_in"]
        he_out = mm(h, params["w_out"].T) + params["b_out"]
        input_in = mm(A[:, :, :N], he_in) + params["b_iah"]
        input_out = mm(A[:, :, N:2 * N], he_out) + params["b_oah"]
        inputs = jnp.concatenate([input_in, input_out], axis=2)
        gi = mm(inputs, params["w_ih"].T) + params["b_ih"]
        gh = mm(h, params["w_hh"].T) + params["b_hh"]
        i_r, i_i, i_n = jnp.split(gi, 3, axis=2)
        h_r, h_i, h_n = jnp.split(gh, 3, axis=2)
        resetgate = jax.nn.sigmoid(i_r + h_r)
        inputgate = jax.nn.sigmoid(i_i + h_i)
        newgate = jnp.tanh(i_n + resetgate * h_n)
        h = newgate + inputgate * (h - newgate)
    return h


if __name__ == "__main__":
    B, N, H = 2, 8, 32
    step = 2
    key = jax.random.PRNGKey(0)
    ks = jax.random.split(key, 12)

    stdv = 1.0 / (H ** 0.5)
    u = lambda k, shape: jax.random.uniform(k, shape, jnp.float32, -stdv, stdv)

    params = {
        "w_ih": u(ks[0], (3 * H, 2 * H)),
        "w_hh": u(ks[1], (3 * H, H)),
        "b_ih": u(ks[2], (3 * H,)),
        "b_hh": u(ks[3], (3 * H,)),
        "b_iah": u(ks[4], (H,)),
        "b_oah": u(ks[5], (H,)),
        "w_in": u(ks[6], (H, H)),
        "b_in": u(ks[7], (H,)),
        "w_out": u(ks[8], (H, H)),
        "b_out": u(ks[9], (H,)),
        # linear_edge_f is declared in the PyTorch __init__ but unused in
        # forward(), so it is intentionally not implemented here.
    }

    A = jax.random.uniform(ks[10], (B, N, 2 * N), jnp.float32, 0.0, 1.0)
    hidden = jax.random.normal(ks[11], (B, N, H), jnp.float32)

    # 1) Exact-parity path: f32 MXU operands vs the exact f32 reference.
    out_f32 = jax.block_until_ready(
        gnn_forward(A, hidden, params, step=step, matmul_dtype=jnp.float32))
    ref_f32 = gnn_reference(A, hidden, params, step=step)
    assert jnp.allclose(out_f32, ref_f32, rtol=1e-5, atol=1e-5), \
        "f32 kernel mismatch vs reference"

    # 2) Default fast path: bf16 MXU operands (f32 accumulation / gate math)
    #    vs a reference that emulates the same operand rounding.
    out_bf16 = jax.block_until_ready(gnn_forward(A, hidden, params, step=step))
    ref_bf16 = gnn_reference(A, hidden, params, step=step,
                             matmul_dtype=jnp.bfloat16)
    assert jnp.allclose(out_bf16, ref_bf16, rtol=5e-3, atol=5e-3), \
        "bf16 kernel mismatch vs bf16-operand reference"

    print("KERNEL_OK")
</pallas_src>

<mosaic_0001>
module attributes {stable_mosaic.version = 11 : i64} {
  func.func @_gnn_kernel(%arg0: i32, %arg1: memref<16x16xf32, #tpu.memory_space<vmem>>, %arg2: memref<16x16xf32, #tpu.memory_space<vmem>>, %arg3: memref<16x128xf32, #tpu.memory_space<vmem>>, %arg4: memref<128x128xf32, #tpu.memory_space<vmem>>, %arg5: memref<128x128xf32, #tpu.memory_space<vmem>>, %arg6: memref<256x384xf32, #tpu.memory_space<vmem>>, %arg7: memref<128x384xf32, #tpu.memory_space<vmem>>, %arg8: memref<1x128xf32, #tpu.memory_space<vmem>>, %arg9: memref<1x128xf32, #tpu.memory_space<vmem>>, %arg10: memref<1x128xf32, #tpu.memory_space<vmem>>, %arg11: memref<1x128xf32, #tpu.memory_space<vmem>>, %arg12: memref<1x384xf32, #tpu.memory_space<vmem>>, %arg13: memref<1x384xf32, #tpu.memory_space<vmem>>, %arg14: memref<16x128xf32, #tpu.memory_space<vmem>>) attributes {dimension_semantics = [#tpu.dimension_semantics<parallel>], iteration_bounds = array<i64: 1>, scalar_prefetch = 0 : i64, scratch_operands = 0 : i64, tpu.core_type = #tpu.core_type<tc>, window_params = [{transform_indices = @transform_0, window_bounds = array<i64: 16, 16>}, {transform_indices = @transform_1, window_bounds = array<i64: 16, 16>}, {transform_indices = @transform_2, window_bounds = array<i64: 16, 128>}, {pipeline_mode = #tpu.pipeline_mode<synchronous>, transform_indices = @transform_3, window_bounds = array<i64: 128, 128>}, {pipeline_mode = #tpu.pipeline_mode<synchronous>, transform_indices = @transform_4, window_bounds = array<i64: 128, 128>}, {pipeline_mode = #tpu.pipeline_mode<synchronous>, transform_indices = @transform_5, window_bounds = array<i64: 256, 384>}, {pipeline_mode = #tpu.pipeline_mode<synchronous>, transform_indices = @transform_6, window_bounds = array<i64: 128, 384>}, {pipeline_mode = #tpu.pipeline_mode<synchronous>, transform_indices = @transform_7, window_bounds = array<i64: 1, 128>}, {pipeline_mode = #tpu.pipeline_mode<synchronous>, transform_indices = @transform_8, window_bounds = array<i64: 1, 128>}, {pipeline_mode = #tpu.pipeline_mode<synchronous>, transform_indices = @transform_9, window_bounds = array<i64: 1, 128>}, {pipeline_mode = #tpu.pipeline_mode<synchronous>, transform_indices = @transform_10, window_bounds = array<i64: 1, 128>}, {pipeline_mode = #tpu.pipeline_mode<synchronous>, transform_indices = @transform_11, window_bounds = array<i64: 1, 384>}, {pipeline_mode = #tpu.pipeline_mode<synchronous>, transform_indices = @transform_12, window_bounds = array<i64: 1, 384>}, {transform_indices = @transform_13, window_bounds = array<i64: 16, 128>}]} {
    %c0 = arith.constant 0 : index
    %c0_0 = arith.constant 0 : index
    %0 = vector.load %arg8[%c0, %c0_0] : memref<1x128xf32, #tpu.memory_space<vmem>>, vector<1x128xf32>
    %c0_1 = arith.constant 0 : index
    %c0_2 = arith.constant 0 : index
    %1 = vector.load %arg9[%c0_1, %c0_2] : memref<1x128xf32, #tpu.memory_space<vmem>>, vector<1x128xf32>
    %c0_3 = arith.constant 0 : index
    %c0_4 = arith.constant 0 : index
    %2 = vector.load %arg10[%c0_3, %c0_4] : memref<1x128xf32, #tpu.memory_space<vmem>>, vector<1x128xf32>
    %c0_5 = arith.constant 0 : index
    %c0_6 = arith.constant 0 : index
    %3 = vector.load %arg11[%c0_5, %c0_6] : memref<1x128xf32, #tpu.memory_space<vmem>>, vector<1x128xf32>
    %c0_7 = arith.constant 0 : index
    %c0_8 = arith.constant 0 : index
    %4 = vector.load %arg12[%c0_7, %c0_8] : memref<1x384xf32, #tpu.memory_space<vmem>>, vector<1x384xf32>
    %c0_9 = arith.constant 0 : index
    %c0_10 = arith.constant 0 : index
    %5 = vector.load %arg13[%c0_9, %c0_10] : memref<1x384xf32, #tpu.memory_space<vmem>>, vector<1x384xf32>
    %c0_11 = arith.constant 0 : index
    %c0_12 = arith.constant 0 : index
    %6 = vector.load %arg3[%c0_11, %c0_12] : memref<16x128xf32, #tpu.memory_space<vmem>>, vector<16x128xf32>
    %c0_i32 = arith.constant 0 : i32
    %c0_13 = arith.constant 0 : index
    %c0_14 = arith.constant 0 : index
    %7 = vector.load %arg4[%c0_13, %c0_14] : memref<128x128xf32, #tpu.memory_space<vmem>>, vector<128x128xf32>
    %cst = arith.constant dense<0.000000e+00> : vector<16x128xf32>
    %8 = tpu.matmul %6, %7, %cst {dimension_numbers = #tpu.dot_dimension_numbers<[1], [0], [0], [1], [0, 0, 1, 1], [], []>} : vector<16x128xf32>, vector<128x128xf32>, vector<16x128xf32> -> vector<16x128xf32>
    %9 = vector.broadcast %0 : vector<1x128xf32> to vector<16x128xf32>
    %10 = arith.addf %8, %9 : vector<16x128xf32>
    %c0_15 = arith.constant 0 : index
    %c0_16 = arith.constant 0 : index
    %11 = vector.load %arg5[%c0_15, %c0_16] : memref<128x128xf32, #tpu.memory_space<vmem>>, vector<128x128xf32>
    %cst_17 = arith.constant dense<0.000000e+00> : vector<16x128xf32>
    %12 = tpu.matmul %6, %11, %cst_17 {dimension_numbers = #tpu.dot_dimension_numbers<[1], [0], [0], [1], [0, 0, 1, 1], [], []>} : vector<16x128xf32>, vector<128x128xf32>, vector<16x128xf32> -> vector<16x128xf32>
    %13 = vector.broadcast %1 : vector<1x128xf32> to vector<16x128xf32>
    %14 = arith.addf %12, %13 : vector<16x128xf32>
    %c0_18 = arith.constant 0 : index
    %c0_19 = arith.constant 0 : index
    %15 = vector.load %arg1[%c0_18, %c0_19] : memref<16x16xf32, #tpu.memory_space<vmem>>, vector<16x16xf32>
    %cst_20 = arith.constant dense<0.000000e+00> : vector<16x128xf32>
    %16 = tpu.matmul %15, %10, %cst_20 {dimension_numbers = #tpu.dot_dimension_numbers<[1], [0], [0], [1], [0, 0, 1, 1], [], []>} : vector<16x16xf32>, vector<16x128xf32>, vector<16x128xf32> -> vector<16x128xf32>
    %17 = vector.broadcast %2 : vector<1x128xf32> to vector<16x128xf32>
    %18 = arith.addf %16, %17 : vector<16x128xf32>
    %c0_21 = arith.constant 0 : index
    %c0_22 = arith.constant 0 : index
    %19 = vector.load %arg2[%c0_21, %c0_22] : memref<16x16xf32, #tpu.memory_space<vmem>>, vector<16x16xf32>
    %cst_23 = arith.constant dense<0.000000e+00> : vector<16x128xf32>
    %20 = tpu.matmul %19, %14, %cst_23 {dimension_numbers = #tpu.dot_dimension_numbers<[1], [0], [0], [1], [0, 0, 1, 1], [], []>} : vector<16x16xf32>, vector<16x128xf32>, vector<16x128xf32> -> vector<16x128xf32>
    %21 = vector.broadcast %3 : vector<1x128xf32> to vector<16x128xf32>
    %22 = arith.addf %20, %21 : vector<16x128xf32>
    %23 = tpu.concatenate %18, %22 in 1 : vector<16x128xf32>, vector<16x128xf32> -> vector<16x256xf32>
    %c0_24 = arith.constant 0 : index
    %c0_25 = arith.constant 0 : index
    %24 = vector.load %arg6[%c0_24, %c0_25] : memref<256x384xf32, #tpu.memory_space<vmem>>, vector<256x384xf32>
    %cst_26 = arith.constant dense<0.000000e+00> : vector<16x384xf32>
    %25 = tpu.matmul %23, %24, %cst_26 {dimension_numbers = #tpu.dot_dimension_numbers<[1], [0], [0], [1], [0, 0, 1, 1], [], []>} : vector<16x256xf32>, vector<256x384xf32>, vector<16x384xf32> -> vector<16x384xf32>
    %26 = vector.broadcast %4 : vector<1x384xf32> to vector<16x384xf32>
    %27 = arith.addf %25, %26 : vector<16x384xf32>
    %c0_27 = arith.constant 0 : index
    %c0_28 = arith.constant 0 : index
    %28 = vector.load %arg7[%c0_27, %c0_28] : memref<128x384xf32, #tpu.memory_space<vmem>>, vector<128x384xf32>
    %cst_29 = arith.constant dense<0.000000e+00> : vector<16x384xf32>
    %29 = tpu.matmul %6, %28, %cst_29 {dimension_numbers = #tpu.dot_dimension_numbers<[1], [0], [0], [1], [0, 0, 1, 1], [], []>} : vector<16x128xf32>, vector<128x384xf32>, vector<16x384xf32> -> vector<16x384xf32>
    %30 = vector.broadcast %5 : vector<1x384xf32> to vector<16x384xf32>
    %31 = arith.addf %29, %30 : vector<16x384xf32>
    %32 = vector.extract_strided_slice %27 {offsets = [0, 0], sizes = [16, 128], strides = [1, 1]} : vector<16x384xf32> to vector<16x128xf32>
    %33 = vector.extract_strided_slice %27 {offsets = [0, 128], sizes = [16, 128], strides = [1, 1]} : vector<16x384xf32> to vector<16x128xf32>
    %34 = vector.extract_strided_slice %27 {offsets = [0, 256], sizes = [16, 128], strides = [1, 1]} : vector<16x384xf32> to vector<16x128xf32>
    %35 = vector.extract_strided_slice %31 {offsets = [0, 0], sizes = [16, 128], strides = [1, 1]} : vector<16x384xf32> to vector<16x128xf32>
    %36 = vector.extract_strided_slice %31 {offsets = [0, 128], sizes = [16, 128], strides = [1, 1]} : vector<16x384xf32> to vector<16x128xf32>
    %37 = vector.extract_strided_slice %31 {offsets = [0, 256], sizes = [16, 128], strides = [1, 1]} : vector<16x384xf32> to vector<16x128xf32>
    %38 = arith.addf %32, %35 : vector<16x128xf32>
    %39 = arith.negf %38 : vector<16x128xf32>
    %40 = math.exp %39 : vector<16x128xf32>
    %cst_30 = arith.constant 1.000000e+00 : f32
    %41 = vector.broadcast %cst_30 : f32 to vector<16x128xf32>
    %42 = arith.addf %41, %40 : vector<16x128xf32>
    %43 = arith.divf %41, %42 : vector<16x128xf32>
    %44 = arith.addf %33, %36 : vector<16x128xf32>
    %45 = arith.negf %44 : vector<16x128xf32>
    %46 = math.exp %45 : vector<16x128xf32>
    %cst_31 = arith.constant 1.000000e+00 : f32
    %47 = vector.broadcast %cst_31 : f32 to vector<16x128xf32>
    %48 = arith.addf %47, %46 : vector<16x128xf32>
    %49 = arith.divf %47, %48 : vector<16x128xf32>
    %50 = arith.mulf %43, %37 : vector<16x128xf32>
    %51 = arith.addf %34, %50 : vector<16x128xf32>
    %52 = math.tanh %51 : vector<16x128xf32>
    %53 = arith.subf %6, %52 : vector<16x128xf32>
    %54 = arith.mulf %49, %53 : vector<16x128xf32>
    %55 = arith.addf %52, %54 : vector<16x128xf32>
    %c1_i32 = arith.constant 1 : i32
    %c0_32 = arith.constant 0 : index
    %c0_33 = arith.constant 0 : index
    %56 = vector.load %arg4[%c0_32, %c0_33] : memref<128x128xf32, #tpu.memory_space<vmem>>, vector<128x128xf32>
    %cst_34 = arith.constant dense<0.000000e+00> : vector<16x128xf32>
    %57 = tpu.matmul %55, %56, %cst_34 {dimension_numbers = #tpu.dot_dimension_numbers<[1], [0], [0], [1], [0, 0, 1, 1], [], []>} : vector<16x128xf32>, vector<128x128xf32>, vector<16x128xf32> -> vector<16x128xf32>
    %58 = vector.broadcast %0 : vector<1x128xf32> to vector<16x128xf32>
    %59 = arith.addf %57, %58 : vector<16x128xf32>
    %c0_35 = arith.constant 0 : index
    %c0_36 = arith.constant 0 : index
    %60 = vector.load %arg5[%c0_35, %c0_36] : memref<128x128xf32, #tpu.memory_space<vmem>>, vector<128x128xf32>
    %cst_37 = arith.constant dense<0.000000e+00> : vector<16x128xf32>
    %61 = tpu.matmul %55, %60, %cst_37 {dimension_numbers = #tpu.dot_dimension_numbers<[1], [0], [0], [1], [0, 0, 1, 1], [], []>} : vector<16x128xf32>, vector<128x128xf32>, vector<16x128xf32> -> vector<16x128xf32>
    %62 = vector.broadcast %1 : vector<1x128xf32> to vector<16x128xf32>
    %63 = arith.addf %61, %62 : vector<16x128xf32>
    %c0_38 = arith.constant 0 : index
    %c0_39 = arith.constant 0 : index
    %64 = vector.load %arg1[%c0_38, %c0_39] : memref<16x16xf32, #tpu.memory_space<vmem>>, vector<16x16xf32>
    %cst_40 = arith.constant dense<0.000000e+00> : vector<16x128xf32>
    %65 = tpu.matmul %64, %59, %cst_40 {dimension_numbers = #tpu.dot_dimension_numbers<[1], [0], [0], [1], [0, 0, 1, 1], [], []>} : vector<16x16xf32>, vector<16x128xf32>, vector<16x128xf32> -> vector<16x128xf32>
    %66 = vector.broadcast %2 : vector<1x128xf32> to vector<16x128xf32>
    %67 = arith.addf %65, %66 : vector<16x128xf32>
    %c0_41 = arith.constant 0 : index
    %c0_42 = arith.constant 0 : index
    %68 = vector.load %arg2[%c0_41, %c0_42] : memref<16x16xf32, #tpu.memory_space<vmem>>, vector<16x16xf32>
    %cst_43 = arith.constant dense<0.000000e+00> : vector<16x128xf32>
    %69 = tpu.matmul %68, %63, %cst_43 {dimension_numbers = #tpu.dot_dimension_numbers<[1], [0], [0], [1], [0, 0, 1, 1], [], []>} : vector<16x16xf32>, vector<16x128xf32>, vector<16x128xf32> -> vector<16x128xf32>
    %70 = vector.broadcast %3 : vector<1x128xf32> to vector<16x128xf32>
    %71 = arith.addf %69, %70 : vector<16x128xf32>
    %72 = tpu.concatenate %67, %71 in 1 : vector<16x128xf32>, vector<16x128xf32> -> vector<16x256xf32>
    %c0_44 = arith.constant 0 : index
    %c0_45 = arith.constant 0 : index
    %73 = vector.load %arg6[%c0_44, %c0_45] : memref<256x384xf32, #tpu.memory_space<vmem>>, vector<256x384xf32>
    %cst_46 = arith.constant dense<0.000000e+00> : vector<16x384xf32>
    %74 = tpu.matmul %72, %73, %cst_46 {dimension_numbers = #tpu.dot_dimension_numbers<[1], [0], [0], [1], [0, 0, 1, 1], [], []>} : vector<16x256xf32>, vector<256x384xf32>, vector<16x384xf32> -> vector<16x384xf32>
    %75 = vector.broadcast %4 : vector<1x384xf32> to vector<16x384xf32>
    %76 = arith.addf %74, %75 : vector<16x384xf32>
    %c0_47 = arith.constant 0 : index
    %c0_48 = arith.constant 0 : index
    %77 = vector.load %arg7[%c0_47, %c0_48] : memref<128x384xf32, #tpu.memory_space<vmem>>, vector<128x384xf32>
    %cst_49 = arith.constant dense<0.000000e+00> : vector<16x384xf32>
    %78 = tpu.matmul %55, %77, %cst_49 {dimension_numbers = #tpu.dot_dimension_numbers<[1], [0], [0], [1], [0, 0, 1, 1], [], []>} : vector<16x128xf32>, vector<128x384xf32>, vector<16x384xf32> -> vector<16x384xf32>
    %79 = vector.broadcast %5 : vector<1x384xf32> to vector<16x384xf32>
    %80 = arith.addf %78, %79 : vector<16x384xf32>
    %81 = vector.extract_strided_slice %76 {offsets = [0, 0], sizes = [16, 128], strides = [1, 1]} : vector<16x384xf32> to vector<16x128xf32>
    %82 = vector.extract_strided_slice %76 {offsets = [0, 128], sizes = [16, 128], strides = [1, 1]} : vector<16x384xf32> to vector<16x128xf32>
    %83 = vector.extract_strided_slice %76 {offsets = [0, 256], sizes = [16, 128], strides = [1, 1]} : vector<16x384xf32> to vector<16x128xf32>
    %84 = vector.extract_strided_slice %80 {offsets = [0, 0], sizes = [16, 128], strides = [1, 1]} : vector<16x384xf32> to vector<16x128xf32>
    %85 = vector.extract_strided_slice %80 {offsets = [0, 128], sizes = [16, 128], strides = [1, 1]} : vector<16x384xf32> to vector<16x128xf32>
    %86 = vector.extract_strided_slice %80 {offsets = [0, 256], sizes = [16, 128], strides = [1, 1]} : vector<16x384xf32> to vector<16x128xf32>
    %87 = arith.addf %81, %84 : vector<16x128xf32>
    %88 = arith.negf %87 : vector<16x128xf32>
    %89 = math.exp %88 : vector<16x128xf32>
    %cst_50 = arith.constant 1.000000e+00 : f32
    %90 = vector.broadcast %cst_50 : f32 to vector<16x128xf32>
    %91 = arith.addf %90, %89 : vector<16x128xf32>
    %92 = arith.divf %90, %91 : vector<16x128xf32>
    %93 = arith.addf %82, %85 : vector<16x128xf32>
    %94 = arith.negf %93 : vector<16x128xf32>
    %95 = math.exp %94 : vector<16x128xf32>
    %cst_51 = arith.constant 1.000000e+00 : f32
    %96 = vector.broadcast %cst_51 : f32 to vector<16x128xf32>
    %97 = arith.addf %96, %95 : vector<16x128xf32>
    %98 = arith.divf %96, %97 : vector<16x128xf32>
    %99 = arith.mulf %92, %86 : vector<16x128xf32>
    %100 = arith.addf %83, %99 : vector<16x128xf32>
    %101 = math.tanh %100 : vector<16x128xf32>
    %102 = arith.subf %55, %101 : vector<16x128xf32>
    %103 = arith.mulf %98, %102 : vector<16x128xf32>
    %104 = arith.addf %101, %103 : vector<16x128xf32>
    %c0_52 = arith.constant 0 : index
    %c0_53 = arith.constant 0 : index
    %105 = vector.load %arg14[%c0_52, %c0_53] : memref<16x128xf32, #tpu.memory_space<vmem>>, vector<16x128xf32>
    tpu.vector_store %arg14[%c0_52, %c0_53], %104 {strides = array<i32>} : memref<16x128xf32, #tpu.memory_space<vmem>>, vector<16x128xf32>,
    return
  }
  func.func @transform_0(%arg0: i32) -> (i32, i32) {
    %c0_i32 = arith.constant 0 : i32
    %c0_i32_0 = arith.constant 0 : i32
    return %arg0, %c0_i32 : i32, i32
  }
  func.func @transform_1(%arg0: i32) -> (i32, i32) {
    %c0_i32 = arith.constant 0 : i32
    %c0_i32_0 = arith.constant 0 : i32
    return %arg0, %c0_i32 : i32, i32
  }
  func.func @transform_2(%arg0: i32) -> (i32, i32) {
    %c0_i32 = arith.constant 0 : i32
    %c0_i32_0 = arith.constant 0 : i32
    return %arg0, %c0_i32 : i32, i32
  }
  func.func @transform_3(%arg0: i32) -> (i32, i32) {
    %c0_i32 = arith.constant 0 : i32
    %c0_i32_0 = arith.constant 0 : i32
    %c0_i32_1 = arith.constant 0 : i32
    return %c0_i32, %c0_i32_0 : i32, i32
  }
  func.func @transform_4(%arg0: i32) -> (i32, i32) {
    %c0_i32 = arith.constant 0 : i32
    %c0_i32_0 = arith.constant 0 : i32
    %c0_i32_1 = arith.constant 0 : i32
    return %c0_i32, %c0_i32_0 : i32, i32
  }
  func.func @transform_5(%arg0: i32) -> (i32, i32) {
    %c0_i32 = arith.constant 0 : i32
    %c0_i32_0 = arith.constant 0 : i32
    %c0_i32_1 = arith.constant 0 : i32
    return %c0_i32, %c0_i32_0 : i32, i32
  }
  func.func @transform_6(%arg0: i32) -> (i32, i32) {
    %c0_i32 = arith.constant 0 : i32
    %c0_i32_0 = arith.constant 0 : i32
    %c0_i32_1 = arith.constant 0 : i32
    return %c0_i32, %c0_i32_0 : i32, i32
  }
  func.func @transform_7(%arg0: i32) -> (i32, i32) {
    %c0_i32 = arith.constant 0 : i32
    %c0_i32_0 = arith.constant 0 : i32
    %c0_i32_1 = arith.constant 0 : i32
    return %c0_i32, %c0_i32_0 : i32, i32
  }
  func.func @transform_8(%arg0: i32) -> (i32, i32) {
    %c0_i32 = arith.constant 0 : i32
    %c0_i32_0 = arith.constant 0 : i32
    %c0_i32_1 = arith.constant 0 : i32
    return %c0_i32, %c0_i32_0 : i32, i32
  }
  func.func @transform_9(%arg0: i32) -> (i32, i32) {
    %c0_i32 = arith.constant 0 : i32
    %c0_i32_0 = arith.constant 0 : i32
    %c0_i32_1 = arith.constant 0 : i32
    return %c0_i32, %c0_i32_0 : i32, i32
  }
  func.func @transform_10(%arg0: i32) -> (i32, i32) {
    %c0_i32 = arith.constant 0 : i32
    %c0_i32_0 = arith.constant 0 : i32
    %c0_i32_1 = arith.constant 0 : i32
    return %c0_i32, %c0_i32_0 : i32, i32
  }
  func.func @transform_11(%arg0: i32) -> (i32, i32) {
    %c0_i32 = arith.constant 0 : i32
    %c0_i32_0 = arith.constant 0 : i32
    %c0_i32_1 = arith.constant 0 : i32
    return %c0_i32, %c0_i32_0 : i32, i32
  }
  func.func @transform_12(%arg0: i32) -> (i32, i32) {
    %c0_i32 = arith.constant 0 : i32
    %c0_i32_0 = arith.constant 0 : i32
    %c0_i32_1 = arith.constant 0 : i32
    return %c0_i32, %c0_i32_0 : i32, i32
  }
  func.func @transform_13(%arg0: i32) -> (i32, i32) {
    %c0_i32 = arith.constant 0 : i32
    %c0_i32_0 = arith.constant 0 : i32
    return %arg0, %c0_i32 : i32, i32
  }
}

</mosaic_0001>

<bundles_post_ra>
// kernel: tpu_custom_call.1
= control target key start
LH: loop header
LB: loop body
LE: loop exit
PB: predicated region body
PF: predicated region fallthrough
CT: control target
= control target key end

     0   :  { %18 = vsyncpa [#allocation3], 0  ;;  %s3624_s0 = inlined_call_operand.hbm [shape: f32[16,16], index: 0, kind: input, shape index: {}]   ;;  %s3625_s1 = inlined_call_operand.hbm [shape: f32[16,16], index: 1, kind: input, shape index: {}]   ;;  %s3626_s2 = inlined_call_operand.hbm [shape: f32[16,128], index: 2, kind: input, shape index: {}]   ;;  %s3627_s3 = inlined_call_operand.hbm [shape: f32[128,128], index: 3, kind: input, shape index: {}]   ;;  %s3628_s4 = inlined_call_operand.hbm [shape: f32[128,128], index: 4, kind: input, shape index: {}]   ;;  %s3629_s5 = inlined_call_operand.hbm [shape: f32[256,384], index: 5, kind: input, shape index: {}]   ;;  %s3630_s6 = inlined_call_operand.hbm [shape: f32[128,384], index: 6, kind: input, shape index: {}]   ;;  %s3631_s7 = inlined_call_operand.vmem [shape: f32[1,128], index: 7, kind: input, shape index: {}]   ;;  %s3632_s8 = inlined_call_operand.vmem [shape: f32[1,128], index: 8, kind: input, shape index: {}]   ;;  %s3633_s9 = inlined_call_operand.vmem [shape: f32[1,128], index: 9, kind: input, shape index: {}]   ;;  %s3634_s10 = inlined_call_operand.vmem [shape: f32[1,128], index: 10, kind: input, shape index: {}]   ;;  %s3635_s11 = inlined_call_operand.vmem [shape: f32[1,384], index: 11, kind: input, shape index: {}]   ;;  %s3636_s12 = inlined_call_operand.vmem [shape: f32[1,384], index: 12, kind: input, shape index: {}]   ;;  %s3637_s13 = inlined_call_operand.hbm [shape: f32[16,128], index: 13, kind: output, shape index: {}]  }
   0x1   :  { %19 = vsyncpa [#allocation6], 0 }
   0x2   :  { %20 = vsyncpa [#allocation9], 0 }
   0x3   :  { %21 = vsyncpa [#allocation12], 0 }
   0x4   :  { %22 = vsyncpa [#allocation4], 0  ;;  %s2892_s25 = smov [#allocation5]   ;;  %s2893_s27 = smov [#allocation8]  }
   0x5   :  { %s40_s26 = sshll.u32 %s2892_s25, 4  ;;  %s64_s28 = sshll.u32 %s2893_s27, 4  ;;  %s41_s26 = int_to_ptr.vmem [resolvable:$true] %s40_s26  ;;  %s2975_s28 = int_to_ptr.vmem [resolvable:$true] %s64_s28 }
   0x6   :  { %s2706_s14 = scalar_lea.hbm %s3625_s1, 256 }
   0x7   :  { %p2707_p0 = scmp.ne.s32.totalorder %s3625_s1, %s2706_s14  ;;  %p2710_p1 = scmp.lt.u32.totalorder %s2706_s14, %s3625_s1 }
   0x9   :  { %p2712_p2 = pnand %p2710_p1, %p2707_p0 }
   0xb   :  { %2715 = shalt.err (!%p2712_p2)
}
   0xc   :  { %s2716_s19 = scalar_lea.vmem %s41_s26, 256  ;;  %p2721_p4 = scmp.lt.s32.totalorder %s41_s26, %s41_s26 }
   0xd   :  { %p2717_p3 = scmp.ne.s32.totalorder %s41_s26, %s2716_s19  ;;  %p2722_p5 = scmp.lt.s32.totalorder %s2716_s19, %s2716_s19 }
   0xf   :  { %p2723_p6 = por %p2722_p5, %p2721_p4 }
  0x11   :  { %p2724_p7 = pnand %p2723_p6, %p2717_p3 }
  0x13   :  { %2727 = shalt.err (!%p2724_p7)
}
  0x14   :  { %s2894_s20 = smov 128   ;;  %s2895_s21 = smov 8  }
  0x15   :  { %46 = dma.hbm_to_vmem [thread:$0]  %s3625_s1, 256, %s41_s26, [#allocation6], %s2894_s20, %s2894_s20, %s2895_s21  }
  0x16   :  { %s2728_s27 = scalar_lea.hbm %s3627_s3, 2048 }
  0x17   :  { %p2729_p8 = scmp.ne.s32.totalorder %s3627_s3, %s2728_s27  ;;  %p2732_p9 = scmp.lt.u32.totalorder %s2728_s27, %s3627_s3 }
  0x19   :  { %p2734_p10 = pnand %p2732_p9, %p2729_p8 }
  0x1b   :  { %2737 = shalt.err (!%p2734_p10)
}
  0x1c   :  { %s2738_s16 = scalar_lea.vmem %s2975_s28, 2048  ;;  %p2743_p12 = scmp.lt.s32.totalorder %s2975_s28, %s2975_s28 }
  0x1d   :  { %p2739_p11 = scmp.ne.s32.totalorder %s2975_s28, %s2738_s16  ;;  %p2744_p13 = scmp.lt.s32.totalorder %s2738_s16, %s2738_s16 }
  0x1f   :  { %p2745_p0 = por %p2744_p13, %p2743_p12 }
  0x21   :  { %p2746_p1 = pnand %p2745_p0, %p2739_p11 }
  0x23   :  { %2749 = shalt.err (!%p2746_p1)
}
  0x24   :  { %70 = dma.hbm_to_vmem [thread:$0]  %s3627_s3, 2048, %s2975_s28, [#allocation9], %s2894_s20, %s2894_s20, %s2895_s21  }
  0x25   :  { %s2896_s17 = smov [#allocation11]   ;;  %s2750_s23 = scalar_lea.hbm %s3629_s5, 12288 }
  0x26   :  { %s88_s18 = sshll.u32 %s2896_s17, 4  ;;  %p2751_p2 = scmp.ne.s32.totalorder %s3629_s5, %s2750_s23  ;;  %s89_s18 = int_to_ptr.vmem [resolvable:$true] %s88_s18 }
  0x27   :  { %p2754_p3 = scmp.lt.u32.totalorder %s2750_s23, %s3629_s5 }
  0x29   :  { %p2756_p4 = pnand %p2754_p3, %p2751_p2 }
  0x2b   :  { %2759 = shalt.err (!%p2756_p4)
}
  0x2c   :  { %s2760_s30 = scalar_lea.vmem %s89_s18, 12288  ;;  %p2765_p6 = scmp.lt.s32.totalorder %s89_s18, %s89_s18 }
  0x2d   :  { %p2761_p5 = scmp.ne.s32.totalorder %s89_s18, %s2760_s30  ;;  %p2766_p7 = scmp.lt.s32.totalorder %s2760_s30, %s2760_s30 }
  0x2f   :  { %p2767_p8 = por %p2766_p7, %p2765_p6 }
  0x31   :  { %p2768_p9 = pnand %p2767_p8, %p2761_p5 }
  0x33   :  { %2771 = shalt.err (!%p2768_p9)
}
  0x34   :  { %s2897_s3 = smov 384   ;;  %s2898_s28 = smov 24  }
  0x35   :  { %94 = dma.hbm_to_vmem [thread:$0]  %s3629_s5, 12288, %s89_s18, [#allocation12], %s2897_s3, %s2897_s3, %s2898_s28  }
  0x36   :  { %s2899_s16 = smov [#allocation2]   ;;  %s2900_s26 = smov [#allocation7]  }
  0x37   :  { %s28_s1 = sshll.u32 %s2899_s16, 4  ;;  %s52_s17 = sshll.u32 %s2900_s26, 4  ;;  %s29_s1 = int_to_ptr.vmem [resolvable:$true] %s28_s1  ;;  %s53_s17 = int_to_ptr.vmem [resolvable:$true] %s52_s17 }
  0x38   :  { %s2772_s23 = scalar_lea.hbm %s3624_s0, 256 }
  0x39   :  { %p2773_p10 = scmp.ne.s32.totalorder %s3624_s0, %s2772_s23  ;;  %p2776_p11 = scmp.lt.u32.totalorder %s2772_s23, %s3624_s0 }
  0x3b   :  { %p2778_p12 = pnand %p2776_p11, %p2773_p10 }
  0x3d   :  { %2781 = shalt.err (!%p2778_p12)
}
  0x3e   :  { %s2782_s5 = scalar_lea.vmem %s29_s1, 256  ;;  %p2787_p0 = scmp.lt.s32.totalorder %s29_s1, %s29_s1 }
  0x3f   :  { %p2783_p13 = scmp.ne.s32.totalorder %s29_s1, %s2782_s5  ;;  %p2788_p1 = scmp.lt.s32.totalorder %s2782_s5, %s2782_s5 }
  0x41   :  { %p2789_p2 = por %p2788_p1, %p2787_p0 }
  0x43   :  { %p2790_p3 = pnand %p2789_p2, %p2783_p13 }
  0x45   :  { %2793 = shalt.err (!%p2790_p3)
}
  0x46   :  { %34 = dma.hbm_to_vmem [thread:$0]  %s3624_s0, 256, %s29_s1, [#allocation3], %s2894_s20, %s2894_s20, %s2895_s21  }
  0x47   :  { %s2794_s16 = scalar_lea.hbm %s3626_s2, 256 }
  0x48   :  { %p2795_p4 = scmp.ne.s32.totalorder %s3626_s2, %s2794_s16  ;;  %p2798_p5 = scmp.lt.u32.totalorder %s2794_s16, %s3626_s2 }
  0x4a   :  { %p2800_p6 = pnand %p2798_p5, %p2795_p4 }
  0x4c   :  { %2803 = shalt.err (!%p2800_p6)
}
  0x4d   :  { %s2804_s24 = scalar_lea.vmem %s53_s17, 256  ;;  %p2809_p8 = scmp.lt.s32.totalorder %s53_s17, %s53_s17 }
  0x4e   :  { %p2805_p7 = scmp.ne.s32.totalorder %s53_s17, %s2804_s24  ;;  %p2810_p9 = scmp.lt.s32.totalorder %s2804_s24, %s2804_s24 }
  0x50   :  { %p2811_p10 = por %p2810_p9, %p2809_p8 }
  0x52   :  { %p2812_p11 = pnand %p2811_p10, %p2805_p7 }
  0x54   :  { %2815 = shalt.err (!%p2812_p11)
}
  0x55   :  { %58 = dma.hbm_to_vmem [thread:$0]  %s3626_s2, 256, %s53_s17, [#allocation6], %s2894_s20, %s2894_s20, %s2895_s21  }
  0x56   :  { %s2901_s25 = smov [#allocation10]   ;;  %s2902_s29 = smov [#allocation13]  }
  0x57   :  { %s76_s27 = sshll.u32 %s2901_s25, 4  ;;  %s100_s5 = sshll.u32 %s2902_s29, 4  ;;  %s77_s27 = int_to_ptr.vmem [resolvable:$true] %s76_s27  ;;  %s101_s5 = int_to_ptr.vmem [resolvable:$true] %s100_s5 }
  0x58   :  { %s2816_s14 = scalar_lea.hbm %s3628_s4, 2048 }
  0x59   :  { %p2817_p12 = scmp.ne.s32.totalorder %s3628_s4, %s2816_s14  ;;  %p2820_p13 = scmp.lt.u32.totalorder %s2816_s14, %s3628_s4 }
  0x5b   :  { %p2822_p0 = pnand %p2820_p13, %p2817_p12 }
  0x5d   :  { %2825 = shalt.err (!%p2822_p0)
}
  0x5e   :  { %s2826_s2 = scalar_lea.vmem %s77_s27, 2048  ;;  %p2831_p2 = scmp.lt.s32.totalorder %s77_s27, %s77_s27 }
  0x5f   :  { %p2827_p1 = scmp.ne.s32.totalorder %s77_s27, %s2826_s2  ;;  %p2832_p3 = scmp.lt.s32.totalorder %s2826_s2, %s2826_s2 }
  0x61   :  { %p2833_p4 = por %p2832_p3, %p2831_p2 }
  0x63   :  { %p2834_p5 = pnand %p2833_p4, %p2827_p1 }
  0x65   :  { %2837 = shalt.err (!%p2834_p5)
}
  0x66   :  { %82 = dma.hbm_to_vmem [thread:$0]  %s3628_s4, 2048, %s77_s27, [#allocation9], %s2894_s20, %s2894_s20, %s2895_s21  }
  0x67   :  { %s2838_s0 = scalar_lea.hbm %s3630_s6, 6144 }
  0x68   :  { %p2839_p6 = scmp.ne.s32.totalorder %s3630_s6, %s2838_s0  ;;  %p2842_p7 = scmp.lt.u32.totalorder %s2838_s0, %s3630_s6 }
  0x6a   :  { %p2844_p8 = pnand %p2842_p7, %p2839_p6 }
  0x6c   :  { %2847 = shalt.err (!%p2844_p8)
}
  0x6d   :  { %s2848_s30 = scalar_lea.vmem %s101_s5, 6144  ;;  %p2853_p10 = scmp.lt.s32.totalorder %s101_s5, %s101_s5 }
  0x6e   :  { %p2849_p9 = scmp.ne.s32.totalorder %s101_s5, %s2848_s30  ;;  %p2854_p11 = scmp.lt.s32.totalorder %s2848_s30, %s2848_s30 }
  0x70   :  { %p2855_p12 = por %p2854_p11, %p2853_p10 }
  0x72   :  { %p2856_p13 = pnand %p2855_p12, %p2849_p9 }
  0x74   :  { %2859 = shalt.err (!%p2856_p13)
}
  0x75   :  { %106 = dma.hbm_to_vmem [thread:$0]  %s3630_s6, 6144, %s101_s5, [#allocation12], %s2897_s3, %s2897_s3, %s2898_s28  }
  0x76   :  { %2882 = dma.done.wait [#allocation3], 256  }
  0x77   :  { %2883 = vsyncadd [#allocation3], 4294967040 }
  0x78   :  { %2884 = dma.done.wait [#allocation6], 512  }
  0x79   :  { %2885 = vsyncadd [#allocation6], 4294966784 }
  0x7a   :  { %2886 = dma.done.wait [#allocation9], 4096  }
  0x7b   :  { %2887 = vsyncadd [#allocation9], 4294963200 }
  0x7c   :  { %2888 = dma.done.wait [#allocation12], 18432  }
  0x7d   :  { %2889 = vsyncadd [#allocation12], 4294948864  ;;  %v148_v0 = vld [vmem:[#allocation8] sm:$0xff]  ;;  %v149_v1 = vld [vmem:[#allocation8 + $0x8] sm:$0xff]  ;;  %vm350_vm0 = vcmask 130048  }
  0x7e   :  { %v245_v2 = vld [vmem:[#allocation10] sm:$0xff]  ;;  %v3087_v3 = vpack.c.bf16 %v149_v1, %v148_v0  ;;  %v246_v4 = vld [vmem:[#allocation10 + $0x8] sm:$0xff]  ;;  %v150_v5 = vld [vmem:[#allocation8 + $0x10] sm:$0xff] }
  0x7f   :  { %v151_v6 = vld [vmem:[#allocation8 + $0x18] sm:$0xff]  ;;  %v3089_v7 = vpack.c.bf16 %v246_v4, %v245_v2  ;;  %v247_v9 = vld [vmem:[#allocation10 + $0x10] sm:$0xff]  ;;  %v152_v11 = vld [vmem:[#allocation8 + $0x20] sm:$0xff] }
  0x80   :  { %v3091_v8 = vpack.c.bf16 %v151_v6, %v150_v5  ;;  %v248_v10 = vld [vmem:[#allocation10 + $0x18] sm:$0xff]  ;;  %2166 = vmatprep.subr.bf16.mxu0 %v3087_v3  ;;  %v153_v13 = vld [vmem:[#allocation8 + $0x28] sm:$0xff]  ;;  %v249_v14 = vld [vmem:[#allocation10 + $0x20] sm:$0xff] }
  0x81   :  { %v3094_v12 = vpack.c.bf16 %v248_v10, %v247_v9  ;;  %v250_v15 = vld [vmem:[#allocation10 + $0x28] sm:$0xff]  ;;  %2168 = vmatpush3.bf16.msra.mxu0 %v3087_v3  ;;  %2198 = vmatprep.subr.bf16.mxu1 %v3089_v7  ;;  %v3100_v16 = vpack.c.bf16 %v153_v13, %v152_v11  ;;  %v154_v18 = vld [vmem:[#allocation8 + $0x30] sm:$0xff]  ;;  %v155_v19 = vld [vmem:[#allocation8 + $0x38] sm:$0xff] }
  0x82   :  { %2170 = vmatprep.subr.bf16.mxu0 %v3091_v8  ;;  %2200 = vmatpush3.bf16.msra.mxu1 %v3089_v7  ;;  %v3103_v17 = vpack.c.bf16 %v250_v15, %v249_v14  ;;  %v251_v20 = vld [vmem:[#allocation10 + $0x30] sm:$0xff]  ;;  %v252_v21 = vld [vmem:[#allocation10 + $0x38] sm:$0xff]  ;;  %v3108_v22 = vpack.c.bf16 %v155_v19, %v154_v18  ;;  %v156_v24 = vld [vmem:[#allocation8 + $0x40] sm:$0xff] }
  0x83   :  { %2202 = vmatprep.subr.bf16.mxu1 %v3094_v12  ;;  %v3111_v23 = vpack.c.bf16 %v252_v21, %v251_v20  ;;  %v157_v25 = vld [vmem:[#allocation8 + $0x48] sm:$0xff]  ;;  %v3113_v26 = vld [vmem:[#allocation7] sm:$0xff]  ;;  %v253_v27 = vld [vmem:[#allocation10 + $0x40] sm:$0xff] }
  0x84   :  { %v254_v28 = vld [vmem:[#allocation10 + $0x48] sm:$0xff]  ;;  %1959 = vmatprep.mubr.f32.mxu0 %v3113_v26  ;;  %1994 = vmatprep.mubr.f32.mxu1 %v3113_v26  ;;  %v3120_v29 = vpack.c.bf16 %v157_v25, %v156_v24  ;;  %v158_v31 = vld [vmem:[#allocation8 + $0x50] sm:$0xff]  ;;  %v159_v32 = vld [vmem:[#allocation8 + $0x58] sm:$0xff] }
  0x85   :  { %2172 = vmatpush3.bf16.msra.mxu0 %v3091_v8  ;;  %v3123_v30 = vpack.c.bf16 %v254_v28, %v253_v27  ;;  %v255_v33 = vld [vmem:[#allocation10 + $0x50] sm:$0xff]  ;;  %v256_v34 = vld [vmem:[#allocation10 + $0x58] sm:$0xff]  ;;  %v3128_v35 = vpack.c.bf16 %v159_v32, %v158_v31  ;;  %v160_v37 = vld [vmem:[#allocation8 + $0x60] sm:$0xff] }
  0x86   :  { %2174 = vmatprep.subr.bf16.mxu0 %v3100_v16  ;;  %2204 = vmatpush3.bf16.msra.mxu1 %v3094_v12  ;;  %v3131_v36 = vpack.c.bf16 %v256_v34, %v255_v33  ;;  %v161_v38 = vld [vmem:[#allocation8 + $0x68] sm:$0xff]  ;;  %v257_v39 = vld [vmem:[#allocation10 + $0x60] sm:$0xff]  ;;  %v162_v43 = vld [vmem:[#allocation8 + $0x70] sm:$0xff] }
  0x87   :  { %2206 = vmatprep.subr.bf16.mxu1 %v3103_v17  ;;  %v258_v40 = vld [vmem:[#allocation10 + $0x68] sm:$0xff]  ;;  %v3136_v41 = vpack.c.bf16 %v161_v38, %v160_v37  ;;  %v163_v44 = vld [vmem:[#allocation8 + $0x78] sm:$0xff]  ;;  %v259_v45 = vld [vmem:[#allocation10 + $0x70] sm:$0xff] }
  0x88   :  { %v3139_v42 = vpack.c.bf16 %v258_v40, %v257_v39  ;;  %v260_v46 = vld [vmem:[#allocation10 + $0x78] sm:$0xff]  ;;  %v3144_v47 = vpack.c.bf16 %v163_v44, %v162_v43  ;;  %v3159_v50 = vld [vmem:[#allocation2] sm:$0xff]  ;;  %v574_v52 = vld [vmem:[#allocation11 + $0x1a8] sm:$0xff] }
  0x89   :  { %2176 = vmatpush3.bf16.msra.mxu0 %v3100_v16  ;;  %v3147_v48 = vpack.c.bf16 %v260_v46, %v259_v45  ;;  %v3154_v49 = vld [vmem:[#allocation7 + $0x8] sm:$0xff]  ;;  %v571_v51 = vld [vmem:[#allocation11 + $0x190] sm:$0xff]  ;;  %v526_v55 = vld [vmem:[#allocation11 + $0x28] sm:$0xff] }
  0x8a   :  { %2178 = vmatprep.subr.bf16.mxu0 %v3108_v22  ;;  %2208 = vmatpush3.bf16.msra.mxu1 %v3103_v17  ;;  %v523_v53 = vld [vmem:[#allocation11 + $0x10] sm:$0xff]  ;;  %v3163_v54 = vpack.c.bf16 %v574_v52, %v571_v51  ;;  %v577_v57 = vld [vmem:[#allocation11 + $0x1c0] sm:$0xff]  ;;  %v580_v58 = vld [vmem:[#allocation11 + $0x1d8] sm:$0xff] }
  0x8b   :  { %2210 = vmatprep.subr.bf16.mxu1 %v3111_v23  ;;  %v3165_v56 = vpack.c.bf16 %v526_v55, %v523_v53  ;;  %v529_v59 = vld [vmem:[#allocation11 + $0x40] sm:$0xff]  ;;  %v3169_v60 = vpack.c.bf16 %v580_v58, %v577_v57  ;;  %v532_v61 = vld [vmem:[#allocation11 + $0x58] sm:$0xff]  ;;  %v583_v63 = vld [vmem:[#allocation11 + $0x1f0] sm:$0xff] }
  0x8c   :  { %v3171_v62 = vpack.c.bf16 %v532_v61, %v529_v59  ;;  %v586_v0 = vld [vmem:[#allocation11 + $0x208] sm:$0xff]  ;;  %v535_v1 = vld [vmem:[#allocation11 + $0x70] sm:$0xff]  ;;  %v589_v6 = vld [vmem:[#allocation11 + $0x220] sm:$0xff] }
  0x8d   :  { %2180 = vmatpush3.bf16.msra.mxu0 %v3108_v22  ;;  %v3175_v2 = vpack.c.bf16 %v586_v0, %v583_v63  ;;  %v538_v4 = vld [vmem:[#allocation11 + $0x88] sm:$0xff]  ;;  %v592_v9 = vld [vmem:[#allocation11 + $0x238] sm:$0xff]  ;;  %v541_v10 = vld [vmem:[#allocation11 + $0xa0] sm:$0xff] }
  0x8e   :  { %2182 = vmatprep.subr.bf16.mxu0 %v3120_v29  ;;  %2212 = vmatpush3.bf16.msra.mxu1 %v3111_v23  ;;  %v3177_v5 = vpack.c.bf16 %v538_v4, %v535_v1  ;;  %v3181_v11 = vpack.c.bf16 %v592_v9, %v589_v6  ;;  %v544_v13 = vld [vmem:[#allocation11 + $0xb8] sm:$0xff]  ;;  %v595_v15 = vld [vmem:[#allocation11 + $0x250] sm:$0xff]  ;;  %v598_v18 = vld [vmem:[#allocation11 + $0x268] sm:$0xff] }
  0x8f   :  { %2214 = vmatprep.subr.bf16.mxu1 %v3123_v30  ;;  %v3183_v14 = vpack.c.bf16 %v544_v13, %v541_v10  ;;  %v547_v19 = vld [vmem:[#allocation11 + $0xd0] sm:$0xff]  ;;  %v3187_v20 = vpack.c.bf16 %v598_v18, %v595_v15  ;;  %v550_v21 = vld [vmem:[#allocation11 + $0xe8] sm:$0xff]  ;;  %v601_v25 = vld [vmem:[#allocation11 + $0x280] sm:$0xff] }
  0x90   :  { %v3189_v24 = vpack.c.bf16 %v550_v21, %v547_v19  ;;  %v604_v27 = vld [vmem:[#allocation11 + $0x298] sm:$0xff]  ;;  %v553_v28 = vld [vmem:[#allocation11 + $0x100] sm:$0xff]  ;;  %v3202_v34 = vld [vmem:[%s3631_s7] ss:$0 sm:$0xff] }
  0x91   :  { %2184 = vmatpush3.bf16.msra.mxu0 %v3120_v29  ;;  %v3193_v31 = vpack.c.bf16 %v604_v27, %v601_v25  ;;  %v556_v32 = vld [vmem:[#allocation11 + $0x118] sm:$0xff]  ;;  %v3207_v37 = vld [vmem:[%s3632_s8] ss:$0 sm:$0xff]  ;;  %v522_v55 = vld [vmem:[#allocation11 + $0x8] sm:$0xff] }
  0x92   :  { %2186 = vmatprep.subr.bf16.mxu0 %v3128_v35  ;;  %2216 = vmatpush3.bf16.msra.mxu1 %v3123_v30  ;;  %v3195_v33 = vpack.c.bf16 %v556_v32, %v553_v28  ;;  %v525_v57 = vld [vmem:[#allocation11 + $0x20] sm:$0xff]  ;;  %v3213_v58 = vld [vmem:[#allocation2 + $0x8] sm:$0xff]  ;;  %v531_v4 = vld [vmem:[#allocation11 + $0x50] sm:$0xff] }
  0x93   :  { %2218 = vmatprep.subr.bf16.mxu1 %v3131_v36  ;;  %v3215_v59 = vld [vmem:[#allocation5] sm:$0xff]  ;;  %v3217_v61 = vpack.c.bf16 %v525_v57, %v522_v55  ;;  %v524_v0 = vld [vmem:[#allocation11 + $0x18] sm:$0xff]  ;;  %v3223_v6 = vld [vmem:[#allocation5 + $0x8] sm:$0xff] }
  0x94   :  { %v521_v63 = vld [vmem:[#allocation11] sm:$0xff]  ;;  %v528_v1 = vld [vmem:[#allocation11 + $0x38] sm:$0xff]  ;;  %v527_v13 = vld [vmem:[#allocation11 + $0x30] sm:$0xff] }
  0x95   :  { %2188 = vmatpush3.bf16.msra.mxu0 %v3128_v35  ;;  %v3225_v9 = vpack.c.bf16 %v524_v0, %v521_v63  ;;  %v3228_v10 = vpack.c.bf16 %v531_v4, %v528_v1  ;;  %v530_v15 = vld [vmem:[#allocation11 + $0x48] sm:$0xff]  ;;  %v537_v19 = vld [vmem:[#allocation11 + $0x80] sm:$0xff]  ;;  %v536_v28 = vld [vmem:[#allocation11 + $0x78] sm:$0xff] }
  0x96   :  { %2190 = vmatprep.subr.bf16.mxu0 %v3136_v41  ;;  %2220 = vmatpush3.bf16.msra.mxu1 %v3131_v36  ;;  %v534_v18 = vld [vmem:[#allocation11 + $0x68] sm:$0xff]  ;;  %v3233_v21 = vpack.c.bf16 %v530_v15, %v527_v13  ;;  %v533_v27 = vld [vmem:[#allocation11 + $0x60] sm:$0xff]  ;;  %v540_v32 = vld [vmem:[#allocation11 + $0x98] sm:$0xff] }
  0x97   :  { %2222 = vmatprep.subr.bf16.mxu1 %v3139_v42  ;;  %3686 = vst [vmem:[#allocation20_spill] sm:$0xff] %v3228_v10  ;;  %v3236_v25 = vpack.c.bf16 %v537_v19, %v534_v18  ;;  %v548_v55 = vld [vmem:[#allocation11 + $0xd8] sm:$0xff]  ;;  %v555_v63 = vld [vmem:[#allocation11 + $0x110] sm:$0xff]  ;;  %v554_v13 = vld [vmem:[#allocation11 + $0x108] sm:$0xff] }
  0x98   :  { %3687 = vst [vmem:[#allocation21_spill] sm:$0xff] %v3233_v21  ;;  %v552_v57 = vld [vmem:[#allocation11 + $0xf8] sm:$0xff]  ;;  %v551_v4 = vld [vmem:[#allocation11 + $0xf0] sm:$0xff]  ;;  %v558_v15 = vld [vmem:[#allocation11 + $0x128] sm:$0xff] }
  0x99   :  { %2192 = vmatpush3.bf16.msra.mxu0 %v3136_v41  ;;  %3688 = vst [vmem:[#allocation22_spill] sm:$0xff] %v3236_v25  ;;  %v3254_v1 = vpack.c.bf16 %v555_v63, %v552_v57  ;;  %v561_v18 = vld [vmem:[#allocation11 + $0x140] sm:$0xff]  ;;  %v3257_v19 = vpack.c.bf16 %v554_v13, %v551_v4 }
  0x9a   :  { %2194 = vmatprep.subr.bf16.mxu0 %v3144_v47  ;;  %2224 = vmatpush3.bf16.msra.mxu1 %v3139_v42  ;;  %v573_v57 = vld [vmem:[#allocation11 + $0x1a0] sm:$0xff] }
  0x9b   :  { %2226 = vmatprep.subr.bf16.mxu1 %v3147_v48  ;;  %3694 = vst [vmem:[#allocation28_spill] sm:$0xff] %v3254_v1  ;;  %3695 = vst [vmem:[#allocation29_spill] sm:$0xff] %v3257_v19  ;;  %v569_v13 = vld [vmem:[#allocation11 + $0x180] sm:$0xff] }
  0x9d   :  { %2196 = vmatpush3.bf16.msra.mxu0 %v3144_v47 }
  0x9e   :  { %2228 = vmatpush3.bf16.msra.mxu1 %v3147_v48 }
  0x9f   :  { %2302 = vmatprep.subr.bf16.mxu1 %v3163_v54 }
  0xa0   :  { %1960 = vmatmul.mubr.f32.vlgmr.msra.gmra.mrb[0].mxu0 %v3154_v49 }
  0xa1   :  { %1995 = vmatmul.mubr.f32.vlgmr.msra.gmra.mrb[0].mxu1 %v3154_v49  ;;  %2001 = vmatprep.mubr.msk.f32.mxu0 %vm350_vm0, %v3159_v50 }
  0xa2   :  { %2304 = vmatpush3.bf16.msra.mxu1 %v3165_v56 }
  0xa3   :  { %2306 = vmatprep.subr.bf16.mxu1 %v3169_v60 }
  0xa6   :  { %2308 = vmatpush3.bf16.msra.mxu1 %v3171_v62 }
  0xa7   :  { %2310 = vmatprep.subr.bf16.mxu1 %v3175_v2 }
  0xaa   :  { %2312 = vmatpush3.bf16.msra.mxu1 %v3177_v5 }
  0xab   :  { %2314 = vmatprep.subr.bf16.mxu1 %v3181_v11 }
  0xae   :  { %2316 = vmatpush3.bf16.msra.mxu1 %v3183_v14 }
  0xaf   :  { %2318 = vmatprep.subr.bf16.mxu1 %v3187_v20 }
  0xb2   :  { %2320 = vmatpush3.bf16.msra.mxu1 %v3189_v24 }
  0xb3   :  { %2322 = vmatprep.subr.bf16.mxu1 %v3193_v31 }
  0xb6   :  { %2324 = vmatpush3.bf16.msra.mxu1 %v3195_v33 }
 0x173   :  { %v1961_v38 = vpop.f32.mrb[0].mxu0 }
 0x174   :  { %v242_v39 = vadd.f32 %v1961_v38, %v3202_v34  ;;  %v236_v40 = vpop.f32.mrb[1].mxu0  ;;  %v1996_v43 = vpop.f32.mrb[0].mxu1  ;;  %v543_v38 = vld [vmem:[#allocation11 + $0xb0] sm:$0xff] }
 0x175   :  { %v237_v44 = vadd.f32 %v3202_v34, %v236_v40  ;;  %v339_v45 = vadd.f32 %v1996_v43, %v3207_v37  ;;  %v333_v46 = vpop.f32.mrb[1].mxu1  ;;  %v3242_v40 = vpack.c.bf16 %v543_v38, %v540_v32  ;;  %v539_v43 = vld [vmem:[#allocation11 + $0x90] sm:$0xff]  ;;  %v560_v32 = vld [vmem:[#allocation11 + $0x138] sm:$0xff] }
 0x176   :  { %v334_v51 = vadd.f32 %v3207_v37, %v333_v46  ;;  %v549_v46 = vld [vmem:[#allocation11 + $0xe0] sm:$0xff]  ;;  %v564_v38 = vld [vmem:[#allocation11 + $0x158] sm:$0xff] }
 0x177   :  { %v2229_v52 = vpack.c.bf16 %v242_v39, %v237_v44  ;;  %v3239_v39 = vpack.c.bf16 %v536_v28, %v533_v27  ;;  %3690 = vst [vmem:[#allocation24_spill] sm:$0xff] %v3242_v40  ;;  %v542_v44 = vld [vmem:[#allocation11 + $0xa8] sm:$0xff]  ;;  %v3260_v27 = vpack.c.bf16 %v561_v18, %v558_v15  ;;  %v557_v28 = vld [vmem:[#allocation11 + $0x120] sm:$0xff]  ;;  %v572_v15 = vld [vmem:[#allocation11 + $0x198] sm:$0xff] }
 0x178   :  { %v2233_v53 = vpack.c.bf16 %v339_v45, %v334_v51  ;;  %v546_v45 = vld [vmem:[#allocation11 + $0xc8] sm:$0xff]  ;;  %v3245_v51 = vpack.c.bf16 %v542_v44, %v539_v43  ;;  %v567_v43 = vld [vmem:[#allocation11 + $0x170] sm:$0xff]  ;;  %v3263_v44 = vpack.c.bf16 %v560_v32, %v557_v28  ;;  %v576_v18 = vld [vmem:[#allocation11 + $0x1b8] sm:$0xff]  ;;  %v3275_v32 = vpack.c.bf16 %v572_v15, %v569_v13 }
 0x179   :  { %2230 = vmatprep.subr.bf16.mxu0 %v2229_v52  ;;  %3689 = vst [vmem:[#allocation23_spill] sm:$0xff] %v3239_v39  ;;  %3696 = vst [vmem:[#allocation30_spill] sm:$0xff] %v3260_v27  ;;  %v579_v28 = vld [vmem:[#allocation11 + $0x1d0] sm:$0xff]  ;;  %v588_v13 = vld [vmem:[#allocation11 + $0x218] sm:$0xff] }
 0x17a   :  { %2232 = vmatpush3.bf16.msra.mxu0 %v2229_v52  ;;  %3691 = vst [vmem:[#allocation25_spill] sm:$0xff] %v3245_v51  ;;  %v3248_v52 = vpack.c.bf16 %v549_v46, %v546_v45  ;;  %3697 = vst [vmem:[#allocation31_spill] sm:$0xff] %v3263_v44  ;;  %v3266_v45 = vpack.c.bf16 %v567_v43, %v564_v38  ;;  %v563_v46 = vld [vmem:[#allocation11 + $0x150] sm:$0xff]  ;;  %v3278_v38 = vpack.c.bf16 %v579_v28, %v576_v18 }
 0x17b   :  { %2234 = vmatprep.subr.bf16.mxu0 %v2233_v53  ;;  %3701 = vst [vmem:[#allocation35_spill] sm:$0xff] %v3275_v32  ;;  %v575_v43 = vld [vmem:[#allocation11 + $0x1b0] sm:$0xff] }
 0x17c   :  { %3692 = vst [vmem:[#allocation26_spill] sm:$0xff] %v3248_v52  ;;  %3698 = vst [vmem:[#allocation32_spill] sm:$0xff] %v3266_v45  ;;  %v591_v15 = vld [vmem:[#allocation11 + $0x230] sm:$0xff] }
 0x17d   :  { %2002 = vmatmul.mubr.msk.f32.vlgmr.msra.gmra.mrb[2].mxu0 %vm350_vm0, %v3213_v58  ;;  %3702 = vst [vmem:[#allocation36_spill] sm:$0xff] %v3278_v38  ;;  %v3290_v28 = vpack.c.bf16 %v591_v15, %v588_v13 }
 0x17e   :  { %2236 = vmatpush3.bf16.msra.mxu0 %v2233_v53  ;;  %2008 = vmatprep.mubr.msk.f32.mxu0 %vm350_vm0, %v3215_v59  ;;  %v545_v53 = vld [vmem:[#allocation11 + $0xc0] sm:$0xff] }
 0x17f   :  { %2238 = vmatprep.subr.bf16.mxu0 %v3217_v61  ;;  %v3251_v0 = vpack.c.bf16 %v548_v55, %v545_v53  ;;  %v566_v53 = vld [vmem:[#allocation11 + $0x168] sm:$0xff]  ;;  %3706 = vst [vmem:[#allocation40_spill] sm:$0xff] %v3290_v28 }
 0x180   :  { %v570_v55 = vld [vmem:[#allocation11 + $0x188] sm:$0xff]  ;;  %v3269_v63 = vpack.c.bf16 %v566_v53, %v563_v46  ;;  %v585_v53 = vld [vmem:[#allocation11 + $0x200] sm:$0xff] }
 0x181   :  { %2009 = vmatmul.mubr.msk.f32.vlgmr.msra.gmra.mrb[4].mxu0 %vm350_vm0, %v3223_v6  ;;  %3693 = vst [vmem:[#allocation27_spill] sm:$0xff] %v3251_v0  ;;  %v3272_v4 = vpack.c.bf16 %v573_v57, %v570_v55  ;;  %v582_v46 = vld [vmem:[#allocation11 + $0x1e8] sm:$0xff] }
 0x182   :  { %2240 = vmatpush1.bf16.msra.mxu0 %v3225_v9  ;;  %3699 = vst [vmem:[#allocation33_spill] sm:$0xff] %v3269_v63  ;;  %v3284_v57 = vpack.c.bf16 %v585_v53, %v582_v46 }
 0x183   :  { %2242 = vmatprep.subr.bf16.mxu0 %v3228_v10  ;;  %3700 = vst [vmem:[#allocation34_spill] sm:$0xff] %v3272_v4  ;;  %v801_v10 = vld [vmem:[#allocation13 + $0x80] sm:$0xff] }
 0x184   :  { %3704 = vst [vmem:[#allocation38_spill] sm:$0xff] %v3284_v57 }
 0x186   :  { %2244 = vmatpush1.bf16.msra.mxu0 %v3233_v21  ;;  %v798_v21 = vld [vmem:[#allocation13 + $0x68] sm:$0xff] }
 0x187   :  { %2246 = vmatprep.subr.bf16.mxu0 %v3236_v25 }
 0x18a   :  { %2248 = vmatpush1.bf16.msra.mxu0 %v3239_v39  ;;  %v796_v39 = vld [vmem:[#allocation13 + $0x58] sm:$0xff] }
 0x18b   :  { %2250 = vmatprep.subr.bf16.mxu0 %v3242_v40  ;;  %v793_v40 = vld [vmem:[#allocation13 + $0x40] sm:$0xff] }
 0x18e   :  { %2252 = vmatpush1.bf16.msra.mxu0 %v3245_v51  ;;  %v794_v51 = vld [vmem:[#allocation13 + $0x48] sm:$0xff] }
 0x18f   :  { %2254 = vmatprep.subr.bf16.mxu0 %v3248_v52 }
 0x192   :  { %2256 = vmatpush1.bf16.msra.mxu0 %v3251_v0 }
 0x193   :  { %2258 = vmatprep.subr.bf16.mxu0 %v3254_v1  ;;  %v791_v1 = vld [vmem:[#allocation13 + $0x30] sm:$0xff] }
 0x196   :  { %2260 = vmatpush1.bf16.msra.mxu0 %v3257_v19 }
 0x197   :  { %2262 = vmatprep.subr.bf16.mxu0 %v3260_v27 }
 0x19a   :  { %2264 = vmatpush1.bf16.msra.mxu0 %v3263_v44  ;;  %v578_v44 = vld [vmem:[#allocation11 + $0x1c8] sm:$0xff] }
 0x19b   :  { %2266 = vmatprep.subr.bf16.mxu0 %v3266_v45  ;;  %v3281_v55 = vpack.c.bf16 %v578_v44, %v575_v43  ;;  %v581_v45 = vld [vmem:[#allocation11 + $0x1e0] sm:$0xff]  ;;  %v594_v44 = vld [vmem:[#allocation11 + $0x248] sm:$0xff] }
 0x19c   :  { %v597_v43 = vld [vmem:[#allocation11 + $0x260] sm:$0xff] }
 0x19d   :  { %3703 = vst [vmem:[#allocation37_spill] sm:$0xff] %v3281_v55  ;;  %v3296_v53 = vpack.c.bf16 %v597_v43, %v594_v44  ;;  %v609_v44 = vld [vmem:[#allocation11 + $0x2c0] sm:$0xff] }
 0x19e   :  { %2268 = vmatpush1.bf16.msra.mxu0 %v3269_v63  ;;  %v584_v63 = vld [vmem:[#allocation11 + $0x1f8] sm:$0xff] }
 0x19f   :  { %2270 = vmatprep.subr.bf16.mxu0 %v3272_v4  ;;  %v3287_v18 = vpack.c.bf16 %v584_v63, %v581_v45  ;;  %v587_v4 = vld [vmem:[#allocation11 + $0x210] sm:$0xff]  ;;  %3708 = vst [vmem:[#allocation42_spill] sm:$0xff] %v3296_v53  ;;  %v600_v45 = vld [vmem:[#allocation11 + $0x278] sm:$0xff] }
 0x1a0   :  { %v603_v63 = vld [vmem:[#allocation11 + $0x290] sm:$0xff] }
 0x1a1   :  { %3705 = vst [vmem:[#allocation39_spill] sm:$0xff] %v3287_v18  ;;  %v3302_v15 = vpack.c.bf16 %v603_v63, %v600_v45  ;;  %v610_v45 = vld [vmem:[#allocation11 + $0x2c8] sm:$0xff]  ;;  %v559_v63 = vld [vmem:[#allocation11 + $0x130] sm:$0xff] }
 0x1a2   :  { %2272 = vmatpush1.bf16.msra.mxu0 %v3275_v32  ;;  %v590_v32 = vld [vmem:[#allocation11 + $0x228] sm:$0xff] }
 0x1a3   :  { %2274 = vmatprep.subr.bf16.mxu0 %v3278_v38  ;;  %v3293_v46 = vpack.c.bf16 %v590_v32, %v587_v4  ;;  %v593_v38 = vld [vmem:[#allocation11 + $0x240] sm:$0xff]  ;;  %3710 = vst [vmem:[#allocation44_spill] sm:$0xff] %v3302_v15  ;;  %v606_v32 = vld [vmem:[#allocation11 + $0x2a8] sm:$0xff] }
 0x1a4   :  { %v3309_v43 = vpack.c.bf16 %v609_v44, %v606_v32  ;;  %v611_v44 = vld [vmem:[#allocation11 + $0x2d0] sm:$0xff] }
 0x1a5   :  { %3707 = vst [vmem:[#allocation41_spill] sm:$0xff] %v3293_v46 }
 0x1a6   :  { %2276 = vmatpush1.bf16.msra.mxu0 %v3281_v55  ;;  %v596_v55 = vld [vmem:[#allocation11 + $0x258] sm:$0xff]  ;;  %3712 = vst [vmem:[#allocation46_spill] sm:$0xff] %v3309_v43 }
 0x1a7   :  { %2278 = vmatprep.subr.bf16.mxu0 %v3284_v57  ;;  %v3299_v13 = vpack.c.bf16 %v596_v55, %v593_v38  ;;  %v599_v57 = vld [vmem:[#allocation11 + $0x270] sm:$0xff]  ;;  %v605_v38 = vld [vmem:[#allocation11 + $0x2a0] sm:$0xff]  ;;  %v608_v55 = vld [vmem:[#allocation11 + $0x2b8] sm:$0xff] }
 0x1a9   :  { %3709 = vst [vmem:[#allocation43_spill] sm:$0xff] %v3299_v13 }
 0x1aa   :  { %2280 = vmatpush1.bf16.msra.mxu0 %v3287_v18  ;;  %v602_v18 = vld [vmem:[#allocation11 + $0x288] sm:$0xff] }
 0x1ab   :  { %2282 = vmatprep.subr.bf16.mxu0 %v3290_v28  ;;  %v3305_v4 = vpack.c.bf16 %v602_v18, %v599_v57  ;;  %v562_v28 = vld [vmem:[#allocation11 + $0x148] sm:$0xff] }
 0x1ac   :  { %v3316_v18 = vpack.c.bf16 %v562_v28, %v559_v63 }
 0x1ad   :  { %3711 = vst [vmem:[#allocation45_spill] sm:$0xff] %v3305_v4 }
 0x1ae   :  { %2284 = vmatpush1.bf16.msra.mxu0 %v3293_v46  ;;  %v607_v46 = vld [vmem:[#allocation11 + $0x2b0] sm:$0xff] }
 0x1af   :  { %2286 = vmatprep.subr.bf16.mxu0 %v3296_v53  ;;  %v3311_v53 = vpack.c.bf16 %v608_v55, %v605_v38  ;;  %v3314_v57 = vpack.c.bf16 %v610_v45, %v607_v46  ;;  %v614_v38 = vld [vmem:[#allocation11 + $0x2e8] sm:$0xff]  ;;  %v613_v55 = vld [vmem:[#allocation11 + $0x2e0] sm:$0xff]  ;;  %v568_v45 = vld [vmem:[#allocation11 + $0x178] sm:$0xff] }
 0x1b0   :  { %v565_v46 = vld [vmem:[#allocation11 + $0x160] sm:$0xff] }
 0x1b1   :  { %3713 = vst [vmem:[#allocation47_spill] sm:$0xff] %v3311_v53  ;;  %2326 = vmatprep.subr.bf16.mxu1 %v3314_v57  ;;  %v3328_v63 = vpack.c.bf16 %v568_v45, %v565_v46  ;;  %v3342_v46 = vld [vmem:[%s3634_s10] ss:$0 sm:$0xff]  ;;  %v785_v45 = vld [vmem:[#allocation13] sm:$0xff] }
 0x1b2   :  { %2288 = vmatpush1.bf16.msra.mxu0 %v3299_v13  ;;  %2328 = vmatpush3.bf16.msra.mxu1 %v3316_v18  ;;  %v3323_v13 = vpack.c.bf16 %v614_v38, %v611_v44  ;;  %v787_v44 = vld [vmem:[#allocation13 + $0x10] sm:$0xff]  ;;  %v790_v38 = vld [vmem:[#allocation13 + $0x28] sm:$0xff]  ;;  %3717 = vst [vmem:[#allocation51_spill] sm:$0xff] %v3342_v46 }
 0x1b3   :  { %2290 = vmatprep.subr.bf16.mxu0 %v3302_v15  ;;  %v615_v15 = vld [vmem:[#allocation11 + $0x2f0] sm:$0xff]  ;;  %v3336_v27 = vpack.c.bf16 %v790_v38, %v787_v44 }
 0x1b4   :  { %3715 = vst [vmem:[#allocation49_spill] sm:$0xff] %v3323_v13  ;;  %v795_v44 = vld [vmem:[#allocation13 + $0x50] sm:$0xff] }
 0x1b6   :  { %2292 = vmatpush1.bf16.msra.mxu0 %v3305_v4  ;;  %v612_v4 = vld [vmem:[#allocation11 + $0x2d8] sm:$0xff] }
 0x1b7   :  { %2294 = vmatprep.subr.bf16.mxu0 %v3309_v43  ;;  %v3320_v32 = vpack.c.bf16 %v615_v15, %v612_v4  ;;  %v616_v43 = vld [vmem:[#allocation11 + $0x2f8] sm:$0xff]  ;;  %v786_v15 = vld [vmem:[#allocation13 + $0x8] sm:$0xff]  ;;  %v789_v4 = vld [vmem:[#allocation13 + $0x20] sm:$0xff] }
 0x1b8   :  { %v3326_v28 = vpack.c.bf16 %v616_v43, %v613_v55 }
 0x1b9   :  { %3714 = vst [vmem:[#allocation48_spill] sm:$0xff] %v3320_v32 }
 0x1ba   :  { %2296 = vmatpush1.bf16.msra.mxu0 %v3311_v53  ;;  %2330 = vmatprep.subr.bf16.mxu1 %v3326_v28  ;;  %v3332_v53 = vpack.c.bf16 %v789_v4, %v786_v15  ;;  %v788_v15 = vld [vmem:[#allocation13 + $0x18] sm:$0xff]  ;;  %v3347_v4 = vld [vmem:[%s3633_s9] ss:$0 sm:$0xff] }
 0x1bb   :  { %2298 = vmatprep.subr.bf16.mxu0 %v3320_v32  ;;  %2332 = vmatpush3.bf16.msra.mxu1 %v3328_v63  ;;  %v3350_v19 = vpack.c.bf16 %v788_v15, %v785_v45  ;;  %v3357_v45 = vpack.c.bf16 %v794_v51, %v791_v1  ;;  %v3359_v15 = vpack.c.bf16 %v796_v39, %v793_v40  ;;  %v808_v40 = vld [vmem:[#allocation13 + $0xb8] sm:$0xff]  ;;  %v806_v1 = vld [vmem:[#allocation13 + $0xa8] sm:$0xff] }
 0x1bc   :  { %3716 = vst [vmem:[#allocation50_spill] sm:$0xff] %v3332_v53  ;;  %2366 = vmatprep.subr.bf16.mxu1 %v3336_v27 }
 0x1bd   :  { %3719 = vst [vmem:[#allocation53_spill] sm:$0xff] %v3357_v45  ;;  %3720 = vst [vmem:[#allocation54_spill] sm:$0xff] %v3359_v15 }
 0x1be   :  { %2300 = vmatpush1.bf16.msra.mxu0 %v3323_v13  ;;  %v792_v13 = vld [vmem:[#allocation13 + $0x38] sm:$0xff] }
 0x1bf   :  { %2334 = vmatprep.subr.bf16.mxu0 %v3332_v53  ;;  %v3353_v52 = vpack.c.bf16 %v795_v44, %v792_v13  ;;  %v799_v13 = vld [vmem:[#allocation13 + $0x70] sm:$0xff] }
 0x1c1   :  { %3718 = vst [vmem:[#allocation52_spill] sm:$0xff] %v3353_v52 }
 0x250   :  { %v2003_v43 = vpop.f32.mrb[2].mxu0 }
 0x251   :  { %v423_v55 = vpop.f32.mrb[3].mxu0  ;;  %v429_v44 = vadd.f32 %v2003_v43, %v3347_v4  ;;  %v3671_v43 = vmov 0.0  }
 0x252   :  { %v424_v0 = vadd.f32 %v3347_v4, %v423_v55  ;;  %v802_v55 = vld [vmem:[#allocation13 + $0x88] sm:$0xff] }
 0x253   :  { %v3366_v51 = vpack.c.bf16 %v802_v55, %v799_v13  ;;  %v813_v13 = vld [vmem:[#allocation13 + $0xe0] sm:$0xff] }
 0x254   :  { %v2010_v53 = vpop.f32.mrb[4].mxu0 }
 0x255   :  { %v512_v38 = vpop.f32.mrb[5].mxu0  ;;  %v518_v25 = vadd.f32 %v2010_v53, %v3342_v46  ;;  %v3363_v53 = vpack.c.bf16 %v801_v10, %v798_v21  ;;  %3722 = vst [vmem:[#allocation56_spill] sm:$0xff] %v3366_v51  ;;  %v803_v21 = vld [vmem:[#allocation13 + $0x90] sm:$0xff] }
 0x256   :  { %v513_v32 = vadd.f32 %v3342_v46, %v512_v38  ;;  %v800_v38 = vld [vmem:[#allocation13 + $0x78] sm:$0xff] }
 0x257   :  { %3721 = vst [vmem:[#allocation55_spill] sm:$0xff] %v3363_v53  ;;  %v804_v46 = vld [vmem:[#allocation13 + $0x98] sm:$0xff] }
 0x258   :  { %697 = vmatprep.mubr.f32.mxu0 %v513_v32  ;;  %774 = vmatprep.mubr.f32.mxu1 %v513_v32  ;;  %v797_v32 = vld [vmem:[#allocation13 + $0x60] sm:$0xff] }
 0x259   :  { %698 = vmatmul.mubr.f32.vlgmr.msra.gmra.mrb[6].mxu0 %v424_v0  ;;  %775 = vmatmul.mubr.f32.vlgmr.msra.gmra.mrb[2].mxu1 %v424_v0  ;;  %v807_v0 = vld [vmem:[#allocation13 + $0xb0] sm:$0xff]  ;;  %v3369_v39 = vpack.c.bf16 %v800_v38, %v797_v32  ;;  %v3382_v32 = vpack.c.bf16 %v806_v1, %v803_v21  ;;  %v814_v38 = vld [vmem:[#allocation13 + $0xe8] sm:$0xff]  ;;  %v817_v21 = vld [vmem:[#allocation13 + $0x100] sm:$0xff] }
 0x25a   :  { %2336 = vmatpush1.bf16.msra.mxu0 %v3350_v19  ;;  %703 = vmatprep.mubr.f32.mxu0 %v518_v25  ;;  %v3373_v10 = vpack.c.bf16 %v807_v0, %v804_v46  ;;  %v811_v46 = vld [vmem:[#allocation13 + $0xd0] sm:$0xff]  ;;  %v820_v1 = vld [vmem:[#allocation13 + $0x118] sm:$0xff] }
 0x25b   :  { %779 = vmatprep.mubr.f32.mxu1 %v518_v25  ;;  %2338 = vmatprep.subr.bf16.mxu0 %v3353_v52  ;;  %3723 = vst [vmem:[#allocation57_spill] sm:$0xff] %v3369_v39  ;;  %v805_v25 = vld [vmem:[#allocation13 + $0xa0] sm:$0xff]  ;;  %3725 = vst [vmem:[#allocation59_spill] sm:$0xff] %v3382_v32 }
 0x25c   :  { %2368 = vmatpush3.bf16.msra.mxu1 %v3336_v27  ;;  %3724 = vst [vmem:[#allocation58_spill] sm:$0xff] %v3373_v10  ;;  %v3379_v55 = vpack.c.bf16 %v808_v40, %v805_v25  ;;  %v3389_v25 = vpack.c.bf16 %v814_v38, %v811_v46  ;;  %v825_v52 = vld [vmem:[#allocation13 + $0x140] sm:$0xff]  ;;  %v3399_v46 = vpack.c.bf16 %v820_v1, %v817_v21  ;;  %v826_v38 = vld [vmem:[#allocation13 + $0x148] sm:$0xff] }
 0x25d   :  { %704 = vmatmul.mubr.f32.gmra.mrb[8].mxu0 %v429_v44  ;;  %780 = vmatmul.mubr.f32.gmra.mrb[4].mxu1 %v429_v44  ;;  %v810_v44 = vld [vmem:[#allocation13 + $0xc8] sm:$0xff]  ;;  %v829_v1 = vld [vmem:[#allocation13 + $0x160] sm:$0xff] }
 0x25e   :  { %2340 = vmatpush1.bf16.msra.mxu0 %v3357_v45  ;;  %2370 = vmatprep.subr.bf16.mxu1 %v3359_v15  ;;  %v3385_v0 = vpack.c.bf16 %v813_v13, %v810_v44  ;;  %v816_v45 = vld [vmem:[#allocation13 + $0xf8] sm:$0xff]  ;;  %v815_v13 = vld [vmem:[#allocation13 + $0xf0] sm:$0xff] }
 0x25f   :  { %2342 = vmatprep.subr.bf16.mxu0 %v3363_v53  ;;  %913 = vmatprep.mubr.f32.mxu0 %v3671_v43  ;;  %v809_v43 = vld [vmem:[#allocation13 + $0xc0] sm:$0xff]  ;;  %v812_v53 = vld [vmem:[#allocation13 + $0xd8] sm:$0xff] }
 0x260   :  { %2372 = vmatpush3.bf16.msra.mxu1 %v3359_v15  ;;  %2043 = vmatprep.mubr.f32.mxu1 %v3113_v26  ;;  %3726 = vst [vmem:[#allocation60_spill] sm:$0xff] %v3385_v0  ;;  %v819_v15 = vld [vmem:[#allocation13 + $0x110] sm:$0xff]  ;;  %v3392_v40 = vpack.c.bf16 %v812_v53, %v809_v43 }
 0x261   :  { %2374 = vmatprep.subr.bf16.mxu1 %v3366_v51  ;;  %v3395_v44 = vpack.c.bf16 %v819_v15, %v816_v45  ;;  %v823_v43 = vld [vmem:[#allocation13 + $0x130] sm:$0xff]  ;;  %v821_v15 = vld [vmem:[#allocation13 + $0x120] sm:$0xff] }
 0x262   :  { %2344 = vmatpush1.bf16.msra.mxu0 %v3369_v39  ;;  %3727 = vst [vmem:[#allocation61_spill] sm:$0xff] %v3392_v40  ;;  %v822_v39 = vld [vmem:[#allocation13 + $0x128] sm:$0xff]  ;;  %v3409_v21 = vpack.c.bf16 %v826_v38, %v823_v43 }
 0x263   :  { %2346 = vmatprep.subr.bf16.mxu0 %v3373_v10  ;;  %3728 = vst [vmem:[#allocation62_spill] sm:$0xff] %v3395_v44  ;;  %v818_v10 = vld [vmem:[#allocation13 + $0x108] sm:$0xff]  ;;  %v3405_v45 = vpack.c.bf16 %v825_v52, %v822_v39  ;;  %v827_v39 = vld [vmem:[#allocation13 + $0x150] sm:$0xff] }
 0x264   :  { %2376 = vmatpush3.bf16.msra.mxu1 %v3366_v51  ;;  %v3402_v53 = vpack.c.bf16 %v818_v10, %v815_v13  ;;  %v831_v51 = vld [vmem:[#allocation13 + $0x170] sm:$0xff]  ;;  %v832_v13 = vld [vmem:[#allocation13 + $0x178] sm:$0xff] }
 0x265   :  { %2378 = vmatprep.subr.bf16.mxu1 %v3379_v55 }
 0x266   :  { %2348 = vmatpush1.bf16.msra.mxu0 %v3382_v32  ;;  %v828_v32 = vld [vmem:[#allocation13 + $0x158] sm:$0xff] }
 0x267   :  { %2350 = vmatprep.subr.bf16.mxu0 %v3385_v0  ;;  %v824_v0 = vld [vmem:[#allocation13 + $0x138] sm:$0xff]  ;;  %v3415_v52 = vpack.c.bf16 %v831_v51, %v828_v32  ;;  %v3729_v51 = vmov 0.0  }
 0x268   :  { %2380 = vmatpush3.bf16.msra.mxu1 %v3379_v55  ;;  %v3412_v10 = vpack.c.bf16 %v824_v0, %v821_v15 }
 0x269   :  { %2382 = vmatprep.subr.bf16.mxu1 %v3389_v25 }
 0x26a   :  { %2352 = vmatpush1.bf16.msra.mxu0 %v3392_v40  ;;  %v3419_v40 = vpack.c.bf16 %v832_v13, %v829_v1 }
 0x26b   :  { %2354 = vmatprep.subr.bf16.mxu0 %v3395_v44  ;;  %v830_v44 = vld [vmem:[#allocation13 + $0x168] sm:$0xff] }
 0x26c   :  { %2384 = vmatpush3.bf16.msra.mxu1 %v3389_v25  ;;  %v3422_v43 = vpack.c.bf16 %v830_v44, %v827_v39 }
 0x26d   :  { %2386 = vmatprep.subr.bf16.mxu1 %v3399_v46 }
 0x26e   :  { %2356 = vmatpush1.bf16.msra.mxu0 %v3402_v53 }
 0x26f   :  { %2358 = vmatprep.subr.bf16.mxu0 %v3405_v45 }
 0x270   :  { %2388 = vmatpush3.bf16.msra.mxu1 %v3399_v46 }
 0x271   :  { %2390 = vmatprep.subr.bf16.mxu1 %v3409_v21 }
 0x272   :  { %2360 = vmatpush1.bf16.msra.mxu0 %v3412_v10 }
 0x273   :  { %2362 = vmatprep.subr.bf16.mxu0 %v3415_v52 }
 0x274   :  { %2392 = vmatpush3.bf16.msra.mxu1 %v3409_v21 }
 0x275   :  { %2394 = vmatprep.subr.bf16.mxu1 %v3419_v40 }
 0x276   :  { %2364 = vmatpush1.bf16.msra.mxu0 %v3422_v43 }
 0x277   :  { %2430 = vmatprep.subr.bf16.mxu0 %v3089_v7 }
 0x278   :  { %2396 = vmatpush3.bf16.msra.mxu1 %v3419_v40 }
 0x279   :  { %914 = vmatmul.mubr.f32.vlgmr.msra.gmra.mrb[6].mxu0 %v3113_v26  ;;  %2398 = vmatprep.subr.bf16.mxu1 %v3087_v3 }
 0x27a   :  { %919 = vmatprep.mubr.f32.mxu0 %v3729_v51  ;;  %2432 = vmatpush3.bf16.msra.mxu0 %v3089_v7 }
 0x27b   :  { %2044 = vmatmul.mubr.f32.vlgmr.msra.gmra.mrb[6].mxu1 %v3154_v49  ;;  %2434 = vmatprep.subr.bf16.mxu0 %v3094_v12 }
 0x27c   :  { %2400 = vmatpush3.bf16.msra.mxu1 %v3087_v3 }
 0x27d   :  { %920 = vmatmul.mubr.f32.gmra.mrb[8].mxu0 %v3154_v49  ;;  %2402 = vmatprep.subr.bf16.mxu1 %v3091_v8 }
 0x27e   :  { %2436 = vmatpush3.bf16.msra.mxu0 %v3094_v12 }
 0x27f   :  { %2438 = vmatprep.subr.bf16.mxu0 %v3103_v17 }
 0x280   :  { %2404 = vmatpush3.bf16.msra.mxu1 %v3091_v8 }
 0x281   :  { %2406 = vmatprep.subr.bf16.mxu1 %v3100_v16 }
 0x282   :  { %2440 = vmatpush3.bf16.msra.mxu0 %v3103_v17 }
 0x283   :  { %2442 = vmatprep.subr.bf16.mxu0 %v3111_v23 }
 0x284   :  { %2408 = vmatpush3.bf16.msra.mxu1 %v3100_v16 }
 0x285   :  { %2410 = vmatprep.subr.bf16.mxu1 %v3108_v22 }
 0x286   :  { %2444 = vmatpush3.bf16.msra.mxu0 %v3111_v23 }
 0x287   :  { %2446 = vmatprep.subr.bf16.mxu0 %v3123_v30 }
 0x288   :  { %2412 = vmatpush3.bf16.msra.mxu1 %v3108_v22  ;;  %v618_v22 = vlaneseq }
 0x289   :  { %2414 = vmatprep.subr.bf16.mxu1 %v3120_v29 }
 0x28a   :  { %2448 = vmatpush3.bf16.msra.mxu0 %v3123_v30  ;;  %v619_v23 = vshrl.u32 %v618_v22, 7  ;;  %v145_v30 = vld [vmem:[%s3636_s12] sm:$0x7] }
 0x28b   :  { %2450 = vmatprep.subr.bf16.mxu0 %v3131_v36 }
 0x28c   :  { %2416 = vmatpush3.bf16.msra.mxu1 %v3120_v29  ;;  %v620_v29 = vsub.s32 0, %v619_v23 }
 0x28d   :  { %2418 = vmatprep.subr.bf16.mxu1 %v3128_v35 }
 0x28e   :  { %2452 = vmatpush3.bf16.msra.mxu0 %v3131_v36 }
 0x28f   :  { %2454 = vmatprep.subr.bf16.mxu0 %v3139_v42 }
 0x290   :  { %2420 = vmatpush3.bf16.msra.mxu1 %v3128_v35  ;;  %v144_v35 = vld [vmem:[%s3635_s11] sm:$0x7]  ;;  %s2904_s11 = smov [#allocation14]  }
 0x291   :  { %2422 = vmatprep.subr.bf16.mxu1 %v3136_v41  ;;  %v621_v36 = vrot.slane %v144_v35, %v620_v29  ;;  %s1692_s12 = sshll.u32 %s2904_s11, 4  ;;  %s1693_s12 = int_to_ptr.vmem [resolvable:$true] %s1692_s12 }
 0x292   :  { %2456 = vmatpush3.bf16.msra.mxu0 %v3139_v42  ;;  %s2860_s19 = scalar_lea.vmem %s1693_s12, 256  ;;  %p2865_p1 = scmp.lt.s32.totalorder %s1693_s12, %s1693_s12 }
 0x293   :  { %2458 = vmatprep.subr.bf16.mxu0 %v3147_v48  ;;  %p2861_p0 = scmp.ne.s32.totalorder %s1693_s12, %s2860_s19  ;;  %p2866_p2 = scmp.lt.s32.totalorder %s2860_s19, %s2860_s19 }
 0x294   :  { %2424 = vmatpush3.bf16.msra.mxu1 %v3136_v41  ;;  %v837_v41 = vrot.slane %v145_v30, %v620_v29 }
 0x295   :  { %2426 = vmatprep.subr.bf16.mxu1 %v3144_v47  ;;  %p2867_p3 = por %p2866_p2, %p2865_p1 }
 0x296   :  { %2460 = vmatpush3.bf16.msra.mxu0 %v3147_v48  ;;  %v3472_v42 = vadd.f32 %v837_v41, %v621_v36 }
 0x297   :  { %2534 = vmatprep.subr.bf16.mxu0 %v3163_v54  ;;  %p2868_p4 = pnand %p2867_p3, %p2861_p0 }
 0x298   :  { %2428 = vmatpush3.bf16.msra.mxu1 %v3144_v47  ;;  %v624_v47 = vsub.s32 1, %v619_v23 }
 0x29a   :  { %v625_v32 = vrot.slane %v144_v35, %v624_v47  ;;  %v841_v0 = vrot.slane %v145_v30, %v624_v47 }
 0x29c   :  { %v3475_v39 = vadd.f32 %v841_v0, %v625_v32 }
 0x32c   :  { %v1803_v3 = vpop.f32.mrb[2].mxu1 }
 0x32d   :  { %v1804_v7 = vpop.f32.mrb[3].mxu1 }
 0x32e   :  { %v1805_v8 = vadd.f32 %v1804_v7, %v1803_v3 }
 0x330   :  { %v1806_v12 = vpop.f32.mrb[4].mxu1 }
 0x331   :  { %v1807_v16 = vpop.f32.mrb[5].mxu1 }
 0x332   :  { %v1808_v17 = vadd.f32 %v1807_v16, %v1806_v12 }
 0x34c   :  { %v915_v48 = vpop.f32.mrb[6].mxu0 }
 0x34d   :  { %v2630_v54 = vadd.f32 %v3472_v42, %v915_v48  ;;  %v917_v44 = vpop.f32.mrb[7].mxu0 }
 0x34e   :  { %v2045_v38 = vpop.f32.mrb[6].mxu1  ;;  %v2632_v16 = vadd.f32 %v3475_v39, %v917_v44 }
 0x34f   :  { %v1715_v15 = vmul.f32 -1.442695, %v2630_v54  ;;  %v992_v1 = vpop.f32.mrb[7].mxu1  ;;  %v628_v54 = vsub.s32 2, %v619_v23 }
 0x350   :  { %v921_v13 = vpop.f32.mrb[8].mxu0  ;;  %v1717_v22 = vmul.f32 -1.442695, %v2632_v16 }
 0x351   :  { %2666 = vpow2.f32 %v1715_v15  ;;  %v2634_v3 = vadd.f32 %v3472_v42, %v921_v13  ;;  %v923_v7 = vpop.f32.mrb[9].mxu0  ;;  %v3480_v32 = vrot.slane %v145_v30, %v628_v54  ;;  %v3482_v0 = vrot.slane %v144_v35, %v628_v54 }
 0x352   :  { %v2636_v29 = vadd.f32 %v3475_v39, %v923_v7 }
 0x353   :  { %v1716_v12 = vmul.f32 -1.442695, %v2634_v3  ;;  %v993_v44 = vadd.f32 %v992_v1, %v3480_v32  ;;  %v777_v7 = vadd.f32 %v1805_v8, %v3482_v0 }
 0x354   :  { %v1718_v47 = vmul.f32 -1.442695, %v2636_v29  ;;  %v998_v29 = vadd.f32 %v2045_v38, %v3480_v32 }
 0x355   :  { %2668 = vpow2.f32 %v1716_v12 }
 0x356   :  { %2670 = vpow2.f32 %v1717_v22 }
 0x35b   :  { %v2667_v36 = vpop.eup %2666 }
 0x35c   :  { %v1009_v41 = vadd.f32 1.0, %v2667_v36 }
 0x35e   :  { %2672 = vrcp.f32 %v1009_v41  ;;  %v782_v41 = vadd.f32 %v1808_v17, %v3482_v0 }
 0x35f   :  { %v2669_v48 = vpop.eup %2668  ;;  %2674 = vpow2.f32 %v1718_v47 }
 0x360   :  { %v1010_v15 = vadd.f32 1.0, %v2669_v48  ;;  %v2671_v13 = vpop.eup %2670 }
 0x361   :  { %v1023_v22 = vadd.f32 1.0, %v2671_v13 }
 0x362   :  { %2676 = vrcp.f32 %v1010_v15 }
 0x368   :  { %v2673_v3 = vpop.eup %2672 }
 0x369   :  { %v1029_v12 = vmul.f32 %v2673_v3, %v993_v44  ;;  %v2675_v16 = vpop.eup %2674 }
 0x36a   :  { %v1024_v35 = vadd.f32 1.0, %v2675_v16  ;;  %v3747_v16 = vld [vmem:[#allocation37_spill] sm:$0xff] }
 0x36b   :  { %v1031_v36 = vadd.f32 %v1029_v12, %v777_v7  ;;  %v3745_v7 = vld [vmem:[#allocation35_spill] sm:$0xff]  ;;  %v3746_v12 = vld [vmem:[#allocation36_spill] sm:$0xff] }
 0x36c   :  { %v2677_v23 = vpop.eup %2676 }
 0x36d   :  { %v1030_v30 = vmul.f32 %v2677_v23, %v998_v29  ;;  %2678 = vtanh.f32 %v1031_v36  ;;  %v3749_v29 = vld [vmem:[#allocation39_spill] sm:$0xff]  ;;  %v3750_v36 = vld [vmem:[#allocation40_spill] sm:$0xff]  ;;  %v3751_v23 = vld [vmem:[#allocation41_spill] sm:$0xff] }
 0x36e   :  { %2680 = vrcp.f32 %v1023_v22  ;;  %v3748_v22 = vld [vmem:[#allocation38_spill] sm:$0xff] }
 0x36f   :  { %v1032_v47 = vadd.f32 %v1030_v30, %v782_v41  ;;  %v3752_v41 = vld [vmem:[#allocation42_spill] sm:$0xff]  ;;  %v3753_v30 = vld [vmem:[#allocation43_spill] sm:$0xff] }
 0x371   :  { %2682 = vtanh.f32 %v1032_v47  ;;  %v3755_v47 = vld [vmem:[#allocation45_spill] sm:$0xff] }
 0x372   :  { %2684 = vrcp.f32 %v1024_v35  ;;  %v3754_v35 = vld [vmem:[#allocation44_spill] sm:$0xff] }
 0x377   :  { %v2679_v1 = vpop.eup %2678 }
 0x378   :  { %v1035_v48 = vsub.f32 %v3113_v26, %v2679_v1  ;;  %v2681_v8 = vpop.eup %2680 }
 0x37a   :  { %v1037_v54 = vmul.f32 %v2681_v8, %v1035_v48  ;;  %v3757_v48 = vld [vmem:[#allocation47_spill] sm:$0xff]  ;;  %v3758_v8 = vld [vmem:[#allocation48_spill] sm:$0xff] }
 0x37b   :  { %v2683_v15 = vpop.eup %2682 }
 0x37c   :  { %v3489_v44 = vadd.f32 %v2679_v1, %v1037_v54  ;;  %v1036_v38 = vsub.f32 %v3154_v49, %v2683_v15  ;;  %v2685_v13 = vpop.eup %2684  ;;  %v3756_v1 = vld [vmem:[#allocation46_spill] sm:$0xff]  ;;  %v3759_v54 = vld [vmem:[#allocation49_spill] sm:$0xff] }
 0x37e   :  { %2078 = vmatprep.mubr.f32.mxu1 %v3489_v44  ;;  %2113 = vmatprep.mubr.f32.mxu0 %v3489_v44  ;;  %v1038_v17 = vmul.f32 %v2685_v13, %v1036_v38 }
 0x380   :  { %v3494_v3 = vadd.f32 %v2683_v15, %v1038_v17  ;;  %v3760_v15 = vld [vmem:[#allocation50_spill] sm:$0xff] }
 0x382   :  { %2079 = vmatmul.mubr.f32.vlgmr.msra.gmra.mrb[8].mxu1 %v3494_v3  ;;  %2114 = vmatmul.mubr.f32.vlgmr.msra.gmra.mrb[10].mxu0 %v3494_v3 }
 0x383   :  { %2120 = vmatprep.mubr.msk.f32.mxu1 %vm350_vm0, %v3159_v50  ;;  %2536 = vmatpush3.bf16.msra.mxu0 %v3165_v56 }
 0x384   :  { %2538 = vmatprep.subr.bf16.mxu0 %v3169_v60 }
 0x387   :  { %2540 = vmatpush3.bf16.msra.mxu0 %v3171_v62 }
 0x388   :  { %2542 = vmatprep.subr.bf16.mxu0 %v3175_v2 }
 0x38b   :  { %2544 = vmatpush3.bf16.msra.mxu0 %v3177_v5 }
 0x38c   :  { %2546 = vmatprep.subr.bf16.mxu0 %v3181_v11 }
 0x38f   :  { %2548 = vmatpush3.bf16.msra.mxu0 %v3183_v14 }
 0x390   :  { %2550 = vmatprep.subr.bf16.mxu0 %v3187_v20  ;;  %v3730_v20 = vld [vmem:[#allocation20_spill] sm:$0xff] }
 0x393   :  { %2552 = vmatpush3.bf16.msra.mxu0 %v3189_v24  ;;  %v3731_v24 = vld [vmem:[#allocation21_spill] sm:$0xff] }
 0x394   :  { %2554 = vmatprep.subr.bf16.mxu0 %v3193_v31  ;;  %v3732_v31 = vld [vmem:[#allocation22_spill] sm:$0xff] }
 0x397   :  { %2556 = vmatpush3.bf16.msra.mxu0 %v3195_v33  ;;  %v3733_v33 = vld [vmem:[#allocation23_spill] sm:$0xff] }
 0x398   :  { %2558 = vmatprep.subr.bf16.mxu0 %v3314_v57  ;;  %v3741_v57 = vld [vmem:[#allocation31_spill] sm:$0xff] }
 0x39b   :  { %2560 = vmatpush3.bf16.msra.mxu0 %v3316_v18  ;;  %v3742_v18 = vld [vmem:[#allocation32_spill] sm:$0xff] }
 0x39c   :  { %2562 = vmatprep.subr.bf16.mxu0 %v3326_v28  ;;  %v3743_v28 = vld [vmem:[#allocation33_spill] sm:$0xff] }
 0x39f   :  { %2564 = vmatpush3.bf16.msra.mxu0 %v3328_v63  ;;  %v3744_v63 = vld [vmem:[#allocation34_spill] sm:$0xff] }
 0x3a0   :  { %2598 = vmatprep.subr.bf16.mxu0 %v3336_v27 }
 0x455   :  { %v2080_v26 = vpop.f32.mrb[8].mxu1  ;;  %v2115_v49 = vpop.f32.mrb[10].mxu0 }
 0x456   :  { %v1113_v50 = vadd.f32 %v2080_v26, %v3202_v34  ;;  %v1188_v56 = vadd.f32 %v2115_v49, %v3207_v37  ;;  %v1107_v60 = vpop.f32.mrb[9].mxu1  ;;  %v1182_v62 = vpop.f32.mrb[11].mxu0  ;;  %v3761_v49 = vld [vmem:[#allocation51_spill] sm:$0xff] }
 0x457   :  { %v1108_v2 = vadd.f32 %v3202_v34, %v1107_v60  ;;  %v1183_v5 = vadd.f32 %v3207_v37, %v1182_v62  ;;  %v3734_v34 = vld [vmem:[#allocation24_spill] sm:$0xff]  ;;  %v3735_v37 = vld [vmem:[#allocation25_spill] sm:$0xff] }
 0x459   :  { %v2461_v11 = vpack.c.bf16 %v1113_v50, %v1108_v2  ;;  %v2465_v14 = vpack.c.bf16 %v1188_v56, %v1183_v5  ;;  %v3762_v2 = vld [vmem:[#allocation52_spill] sm:$0xff]  ;;  %v3763_v5 = vld [vmem:[#allocation54_spill] sm:$0xff] }
 0x45b   :  { %2462 = vmatprep.subr.bf16.mxu1 %v2461_v11 }
 0x45c   :  { %2464 = vmatpush3.bf16.msra.mxu1 %v2461_v11  ;;  %v3764_v11 = vld [vmem:[#allocation53_spill] sm:$0xff] }
 0x45d   :  { %2466 = vmatprep.subr.bf16.mxu1 %v2465_v14 }
 0x45f   :  { %2121 = vmatmul.mubr.msk.f32.vlgmr.msra.gmra.mrb[10].mxu1 %vm350_vm0, %v3213_v58  ;;  %v3736_v58 = vld [vmem:[#allocation26_spill] sm:$0xff] }
 0x460   :  { %2468 = vmatpush3.bf16.msra.mxu1 %v2465_v14  ;;  %2127 = vmatprep.mubr.msk.f32.mxu1 %vm350_vm0, %v3215_v59  ;;  %v3737_v59 = vld [vmem:[#allocation27_spill] sm:$0xff] }
 0x461   :  { %2470 = vmatprep.subr.bf16.mxu1 %v3217_v61  ;;  %v3738_v61 = vld [vmem:[#allocation28_spill] sm:$0xff]  ;;  %v3765_v14 = vld [vmem:[#allocation55_spill] sm:$0xff] }
 0x463   :  { %2128 = vmatmul.mubr.msk.f32.vlgmr.msra.gmra.mrb[12].mxu1 %vm350_vm0, %v3223_v6  ;;  %v3739_v6 = vld [vmem:[#allocation29_spill] sm:$0xff] }
 0x464   :  { %2472 = vmatpush1.bf16.msra.mxu1 %v3225_v9  ;;  %v3740_v9 = vld [vmem:[#allocation30_spill] sm:$0xff] }
 0x465   :  { %2474 = vmatprep.subr.bf16.mxu1 %v3730_v20  ;;  %v3769_v20 = vld [vmem:[#allocation59_spill] sm:$0xff] }
 0x468   :  { %2476 = vmatpush1.bf16.msra.mxu1 %v3731_v24  ;;  %v3770_v24 = vld [vmem:[#allocation60_spill] sm:$0xff] }
 0x469   :  { %2478 = vmatprep.subr.bf16.mxu1 %v3732_v31  ;;  %v3771_v31 = vld [vmem:[#allocation61_spill] sm:$0xff] }
 0x46c   :  { %2480 = vmatpush1.bf16.msra.mxu1 %v3733_v33  ;;  %v3772_v33 = vld [vmem:[#allocation62_spill] sm:$0xff] }
 0x46d   :  { %2482 = vmatprep.subr.bf16.mxu1 %v3734_v34 }
 0x470   :  { %2484 = vmatpush1.bf16.msra.mxu1 %v3735_v37 }
 0x471   :  { %2486 = vmatprep.subr.bf16.mxu1 %v3736_v58 }
 0x474   :  { %2488 = vmatpush1.bf16.msra.mxu1 %v3737_v59 }
 0x475   :  { %2490 = vmatprep.subr.bf16.mxu1 %v3738_v61 }
 0x478   :  { %2492 = vmatpush1.bf16.msra.mxu1 %v3739_v6 }
 0x479   :  { %2494 = vmatprep.subr.bf16.mxu1 %v3740_v9 }
 0x47c   :  { %2496 = vmatpush1.bf16.msra.mxu1 %v3741_v57 }
 0x47d   :  { %2498 = vmatprep.subr.bf16.mxu1 %v3742_v18 }
 0x480   :  { %2500 = vmatpush1.bf16.msra.mxu1 %v3743_v28 }
 0x481   :  { %2502 = vmatprep.subr.bf16.mxu1 %v3744_v63 }
 0x484   :  { %2504 = vmatpush1.bf16.msra.mxu1 %v3745_v7 }
 0x485   :  { %2506 = vmatprep.subr.bf16.mxu1 %v3746_v12 }
 0x488   :  { %2508 = vmatpush1.bf16.msra.mxu1 %v3747_v16 }
 0x489   :  { %2510 = vmatprep.subr.bf16.mxu1 %v3748_v22 }
 0x48c   :  { %2512 = vmatpush1.bf16.msra.mxu1 %v3749_v29 }
 0x48d   :  { %2514 = vmatprep.subr.bf16.mxu1 %v3750_v36 }
 0x490   :  { %2516 = vmatpush1.bf16.msra.mxu1 %v3751_v23 }
 0x491   :  { %2518 = vmatprep.subr.bf16.mxu1 %v3752_v41 }
 0x494   :  { %2520 = vmatpush1.bf16.msra.mxu1 %v3753_v30 }
 0x495   :  { %2522 = vmatprep.subr.bf16.mxu1 %v3754_v35 }
 0x498   :  { %2524 = vmatpush1.bf16.msra.mxu1 %v3755_v47 }
 0x499   :  { %2526 = vmatprep.subr.bf16.mxu1 %v3756_v1 }
 0x49c   :  { %2528 = vmatpush1.bf16.msra.mxu1 %v3757_v48 }
 0x49d   :  { %2530 = vmatprep.subr.bf16.mxu1 %v3758_v8 }
 0x4a0   :  { %2532 = vmatpush1.bf16.msra.mxu1 %v3759_v54 }
 0x4a1   :  { %2566 = vmatprep.subr.bf16.mxu1 %v3760_v15 }
 0x532   :  { %v2122_v38 = vpop.f32.mrb[10].mxu1 }
 0x533   :  { %v1257_v13 = vpop.f32.mrb[11].mxu1  ;;  %v1263_v62 = vadd.f32 %v2122_v38, %v3347_v4 }
 0x534   :  { %v1258_v56 = vadd.f32 %v3347_v4, %v1257_v13  ;;  %v3768_v4 = vld [vmem:[#allocation58_spill] sm:$0xff] }
 0x536   :  { %v2129_v17 = vpop.f32.mrb[12].mxu1 }
 0x537   :  { %v1332_v26 = vpop.f32.mrb[13].mxu1  ;;  %v1338_v60 = vadd.f32 %v2129_v17, %v3761_v49 }
 0x538   :  { %v1333_v50 = vadd.f32 %v3761_v49, %v1332_v26 }
 0x53a   :  { %1405 = vmatprep.mubr.f32.mxu1 %v1333_v50  ;;  %1482 = vmatprep.mubr.f32.mxu0 %v1333_v50 }
 0x53b   :  { %1406 = vmatmul.mubr.f32.vlgmr.msra.gmra.mrb[14].mxu1 %v1258_v56  ;;  %1483 = vmatmul.mubr.f32.vlgmr.msra.gmra.mrb[12].mxu0 %v1258_v56 }
 0x53c   :  { %2568 = vmatpush1.bf16.msra.mxu1 %v3350_v19  ;;  %2600 = vmatpush3.bf16.msra.mxu0 %v3336_v27  ;;  %v3766_v19 = vld [vmem:[#allocation56_spill] sm:$0xff]  ;;  %v3767_v27 = vld [vmem:[#allocation57_spill] sm:$0xff] }
 0x53d   :  { %1411 = vmatprep.mubr.f32.mxu1 %v1338_v60  ;;  %1487 = vmatprep.mubr.f32.mxu0 %v1338_v60 }
 0x53e   :  { %2570 = vmatprep.subr.bf16.mxu1 %v3762_v2  ;;  %2602 = vmatprep.subr.bf16.mxu0 %v3763_v5 }
 0x53f   :  { %1412 = vmatmul.mubr.f32.gmra.mrb[16].mxu1 %v1263_v62  ;;  %1488 = vmatmul.mubr.f32.gmra.mrb[14].mxu0 %v1263_v62 }
 0x540   :  { %2572 = vmatpush1.bf16.msra.mxu1 %v3764_v11  ;;  %2604 = vmatpush3.bf16.msra.mxu0 %v3763_v5 }
 0x541   :  { %2162 = vmatprep.mubr.f32.mxu0 %v3489_v44  ;;  %2574 = vmatprep.subr.bf16.mxu1 %v3765_v14 }
 0x542   :  { %2606 = vmatprep.subr.bf16.mxu0 %v3766_v19  ;;  %1557 = vmatprep.mubr.f32.mxu1 %v3729_v51 }
 0x544   :  { %2576 = vmatpush1.bf16.msra.mxu1 %v3767_v27  ;;  %2608 = vmatpush3.bf16.msra.mxu0 %v3766_v19 }
 0x545   :  { %2578 = vmatprep.subr.bf16.mxu1 %v3768_v4  ;;  %2610 = vmatprep.subr.bf16.mxu0 %v3379_v55 }
 0x548   :  { %2580 = vmatpush1.bf16.msra.mxu1 %v3769_v20  ;;  %2612 = vmatpush3.bf16.msra.mxu0 %v3379_v55 }
 0x549   :  { %2582 = vmatprep.subr.bf16.mxu1 %v3770_v24  ;;  %2614 = vmatprep.subr.bf16.mxu0 %v3389_v25 }
 0x54c   :  { %2584 = vmatpush1.bf16.msra.mxu1 %v3771_v31  ;;  %2616 = vmatpush3.bf16.msra.mxu0 %v3389_v25 }
 0x54d   :  { %2586 = vmatprep.subr.bf16.mxu1 %v3772_v33  ;;  %2618 = vmatprep.subr.bf16.mxu0 %v3399_v46 }
 0x550   :  { %2588 = vmatpush1.bf16.msra.mxu1 %v3402_v53  ;;  %2620 = vmatpush3.bf16.msra.mxu0 %v3399_v46 }
 0x551   :  { %2590 = vmatprep.subr.bf16.mxu1 %v3405_v45  ;;  %2622 = vmatprep.subr.bf16.mxu0 %v3409_v21 }
 0x554   :  { %2592 = vmatpush1.bf16.msra.mxu1 %v3412_v10  ;;  %2624 = vmatpush3.bf16.msra.mxu0 %v3409_v21 }
 0x555   :  { %2594 = vmatprep.subr.bf16.mxu1 %v3415_v52  ;;  %2626 = vmatprep.subr.bf16.mxu0 %v3419_v40 }
 0x558   :  { %2596 = vmatpush1.bf16.msra.mxu1 %v3422_v43  ;;  %2628 = vmatpush3.bf16.msra.mxu0 %v3419_v40 }
 0x55b   :  { %1558 = vmatmul.mubr.f32.vlgmr.msra.gmra.mrb[14].mxu1 %v3489_v44  ;;  %2163 = vmatmul.mubr.f32.vlgmr.msra.gmra.mrb[16].mxu0 %v3494_v3 }
 0x55c   :  { %1563 = vmatprep.mubr.f32.mxu1 %v3729_v51 }
 0x55f   :  { %1564 = vmatmul.mubr.f32.gmra.mrb[16].mxu1 %v3494_v3 }
 0x60e   :  { %v1903_v55 = vpop.f32.mrb[12].mxu0 }
 0x60f   :  { %v1904_v25 = vpop.f32.mrb[13].mxu0 }
 0x610   :  { %v1905_v46 = vadd.f32 %v1904_v25, %v1903_v55 }
 0x612   :  { %v1906_v53 = vpop.f32.mrb[14].mxu0  ;;  %v1485_v29 = vadd.f32 %v1905_v46, %v3482_v0 }
 0x613   :  { %v1907_v45 = vpop.f32.mrb[15].mxu0 }
 0x614   :  { %v1908_v21 = vadd.f32 %v1907_v45, %v1906_v53 }
 0x616   :  { %v1490_v47 = vadd.f32 %v1908_v21, %v3482_v0 }
 0x62e   :  { %v1559_v10 = vpop.f32.mrb[14].mxu1  ;;  %v2164_v52 = vpop.f32.mrb[16].mxu0 }
 0x62f   :  { %v2638_v43 = vadd.f32 %v3472_v42, %v1559_v10  ;;  %v1561_v34 = vpop.f32.mrb[15].mxu1  ;;  %v1636_v40 = vpop.f32.mrb[17].mxu0  ;;  %v1642_v41 = vadd.f32 %v2164_v52, %v3480_v32 }
 0x630   :  { %v2640_v6 = vadd.f32 %v3475_v39, %v1561_v34 }
 0x631   :  { %v1723_v37 = vmul.f32 -1.442695, %v2638_v43 }
 0x632   :  { %v1565_v58 = vpop.f32.mrb[16].mxu1  ;;  %v1725_v9 = vmul.f32 -1.442695, %v2640_v6 }
 0x633   :  { %2686 = vpow2.f32 %v1723_v37  ;;  %v2642_v59 = vadd.f32 %v3472_v42, %v1565_v58  ;;  %v1567_v51 = vpop.f32.mrb[17].mxu1  ;;  %v1637_v42 = vadd.f32 %v1636_v40, %v3480_v32 }
 0x634   :  { %v2644_v57 = vadd.f32 %v3475_v39, %v1567_v51 }
 0x635   :  { %v1724_v61 = vmul.f32 -1.442695, %v2642_v59 }
 0x636   :  { %v1726_v63 = vmul.f32 -1.442695, %v2644_v57 }
 0x637   :  { %2688 = vpow2.f32 %v1724_v61 }
 0x638   :  { %2690 = vpow2.f32 %v1725_v9 }
 0x63d   :  { %v2687_v18 = vpop.eup %2686 }
 0x63e   :  { %v1653_v28 = vadd.f32 1.0, %v2687_v18 }
 0x640   :  { %2692 = vrcp.f32 %v1653_v28 }
 0x641   :  { %v2689_v7 = vpop.eup %2688  ;;  %2694 = vpow2.f32 %v1726_v63 }
 0x642   :  { %v1654_v12 = vadd.f32 1.0, %v2689_v7  ;;  %v2691_v16 = vpop.eup %2690 }
 0x643   :  { %v1667_v39 = vadd.f32 1.0, %v2691_v16 }
 0x644   :  { %2696 = vrcp.f32 %v1654_v12 }
 0x64a   :  { %v2693_v22 = vpop.eup %2692 }
 0x64b   :  { %v1673_v36 = vmul.f32 %v2693_v22, %v1637_v42  ;;  %v2695_v23 = vpop.eup %2694 }
 0x64c   :  { %v1668_v48 = vadd.f32 1.0, %v2695_v23 }
 0x64d   :  { %v1675_v30 = vadd.f32 %v1673_v36, %v1485_v29 }
 0x64e   :  { %v2697_v35 = vpop.eup %2696 }
 0x64f   :  { %2698 = vtanh.f32 %v1675_v30  ;;  %v1674_v1 = vmul.f32 %v2697_v35, %v1642_v41 }
 0x650   :  { %2700 = vrcp.f32 %v1667_v39 }
 0x651   :  { %v1676_v8 = vadd.f32 %v1674_v1, %v1490_v47 }
 0x653   :  { %2702 = vtanh.f32 %v1676_v8 }
 0x654   :  { %2704 = vrcp.f32 %v1668_v48 }
 0x659   :  { %v2699_v54 = vpop.eup %2698 }
 0x65a   :  { %v1679_v15 = vsub.f32 %v3489_v44, %v2699_v54  ;;  %v2701_v38 = vpop.eup %2700 }
 0x65c   :  { %v1681_v13 = vmul.f32 %v2701_v38, %v1679_v15 }
 0x65d   :  { %v2703_v17 = vpop.eup %2702 }
 0x65e   :  { %v1680_v32 = vsub.f32 %v3494_v3, %v2703_v17  ;;  %v1683_v26 = vadd.f32 %v2699_v54, %v1681_v13  ;;  %v2705_v49 = vpop.eup %2704 }
 0x660   :  { %v1682_v0 = vmul.f32 %v2705_v49, %v1680_v32  ;;  %1685 = vst [vmem:[#allocation14] sm:$0xff] %v1683_v26 }
 0x662   :  { %v1684_v50 = vadd.f32 %v2703_v17, %v1682_v0 }
 0x664   :  { %1686 = vst [vmem:[#allocation14 + $0x8] sm:$0xff] %v1684_v50 }
 0x665   :  { %2871 = shalt.err (!%p2868_p4)
}
 0x666   :  { %s2872_s22 = scalar_lea.hbm %s3637_s13, 256 }
 0x667   :  { %p2873_p5 = scmp.ne.s32.totalorder %s3637_s13, %s2872_s22  ;;  %p2876_p6 = scmp.lt.u32.totalorder %s2872_s22, %s3637_s13 }
 0x669   :  { %p2878_p7 = pnand %p2876_p6, %p2873_p5 }
 0x66b   :  { %2881 = shalt.err (!%p2878_p7)
}
 0x66c   :  { %1698 = dma.vmem_to_hbm [thread:$0]  %s1693_s12, 256, %s3637_s13, [#allocation4], %s2894_s20, %s2894_s20, %s2895_s21  }
 0x66d   :  { %2890 = dma.done.wait [#allocation4], 256  }
 0x66e   :  { %2891 = vsyncadd [#allocation4], 4294967040 }
 0x66f   :  { %1702 = vsyncpa [#allocation3], 1 }
 0x670   :  { %1703 = vsyncpa [#allocation6], 1 }
 0x671   :  { %1704 = vsyncpa [#allocation9], 1 }
 0x672   :  { %1705 = vsyncpa [#allocation12], 1 }
 0x673   :  { %1706 = vsyncpa [#allocation4], 1 }

</bundles_post_ra>
